<compile_context>
chip_gen: v5e
topology: v5e:2x2
jax: 0.10.0
libtpu: 0.0.40
codegen_flags: <defaults>
</compile_context>

<pallas_src>
import functools

import jax
import jax.numpy as jnp
from jax.experimental import pallas as pl
from jax.experimental.pallas import tpu as pltpu

HIDDEN = 128          # module default hidden_size
EPS = 1e-5
LANES = 256           # lane width of the packed parameter slabs
OUT_LANES = 128       # lane width of the packed output slab
TB_MAX = 1024         # max batch-tile rows


def _rup(x, m):
    return ((x + m - 1) // m) * m


def _any_nan(x):
    return jnp.any(jnp.isnan(x))


def ppo_kernel(obs_ref, lags_ref, wp_ref, vp_ref, out_ref, *, ext, lag, act):
    f32, bf16 = jnp.float32, jnp.bfloat16
    hid = HIDDEN
    half = hid // 2

    # static, 16-aligned row offsets inside the packed bf16 weight slab
    r1a = 0                       # obs  -> lanes [0:hid)        (BN scale folded)
    r1b = r1a + _rup(ext, 16)     # lags -> lanes [hid:hid+half)
    r2 = r1b + _rup(lag, 16)      # feature-extractor L2 (+ identity carry of mkt)
    r3 = r2 + LANES               # folded attention      (+ identity carry of mkt)
    r4 = r3 + LANES               # fused heads L1 + std conditioner
    r5 = r4 + LANES               # fused final layer

    def w(r0, k):
        return wp_ref[r0:r0 + k, :]

    def v(i):
        return vp_ref[i:i + 1, :]

    # torch semantics: sanitize only when any element is NaN.
    obs = obs_ref[...]
    lags = lags_ref[...]
    obs = jnp.where(_any_nan(obs), jnp.nan_to_num(obs), obs)
    lags = jnp.where(_any_nan(lags), jnp.nan_to_num(lags), lags)

    # --- fused L1: one 256-lane pre-activation; lanes [0:hid) = feature
    #     extractor L1, [hid:hid+half) = market encoder L1, rest exactly zero.
    pre = (jnp.dot(obs, w(r1a, ext), preferred_element_type=f32)
           + jnp.dot(lags, w(r1b, lag), preferred_element_type=f32)
           + v(0))

    # --- block LayerNorm over the two lane blocks (masks, no lane slices) ---
    lane = jax.lax.broadcasted_iota(jnp.int32, (1, LANES), 1)
    m_h = (lane < hid).astype(f32)
    m_k = ((lane >= hid) & (lane < hid + half)).astype(f32)
    mu = (jnp.sum(pre * m_h, -1, keepdims=True) * (1.0 / hid) * m_h
          + jnp.sum(pre * m_k, -1, keepdims=True) * (1.0 / half) * m_k)
    cen = pre - mu
    c2 = cen * cen
    rstd = (jax.lax.rsqrt(jnp.sum(c2 * m_h, -1, keepdims=True) * (1.0 / hid) + EPS) * m_h
            + jax.lax.rsqrt(jnp.sum(c2 * m_k, -1, keepdims=True) * (1.0 / half) + EPS) * m_k)
    # gamma/beta rows are zero outside the two blocks -> padding lanes stay 0.
    x1 = jnp.maximum(cen * rstd * v(1) + v(2), 0.0).astype(bf16)

    # --- feature-extractor L2 (+ReLU); market lanes carried via identity ---
    x2 = jnp.maximum(jnp.dot(x1, w(r2, LANES), preferred_element_type=f32) + v(3),
                     0.0).astype(bf16)

    # --- degenerate length-1 self-attention: out_proj(v_proj(x)) (folded);
    #     market lanes carried via identity, no activation on this layer.
    x3 = (jnp.dot(x2, w(r3, LANES), preferred_element_type=f32) + v(4)).astype(bf16)

    # --- fused heads: lanes [0:half)=actor-L1, [half:2h)=value1-L1,
    #     [2h:3h)=value2-L1, [3h:3h+act)=std-conditioner logits.
    heads = jnp.dot(x3, w(r4, LANES), preferred_element_type=f32) + v(5)
    std_logit = heads[:, 3 * half:3 * half + act]          # pre-ReLU extract
    hrelu = jnp.maximum(heads, 0.0).astype(bf16)            # ReLU all 256 lanes

    # --- fused final layer: lanes [0:act)=pre-tanh mean, [act]=v1, [act+1]=v2;
    #     rows under the std lanes are zero, so the extra ReLU above is harmless.
    fin = jnp.dot(hrelu, w(r5, LANES), preferred_element_type=f32) + v(6)

    action_mean = jnp.tanh(fin[:, :act])
    value = jnp.minimum(fin[:, act:act + 1], fin[:, act + 1:act + 2])
    std_base = v(7)[:, :act]                                 # exp(log_std) folded
    action_std = jnp.clip(std_base * (0.5 + jax.nn.sigmoid(std_logit)), 0.01, 1.0)

    # torch semantics: if ANY element of an output is NaN, replace the whole output.
    action_mean = jnp.where(_any_nan(action_mean), 0.0, action_mean)
    action_std = jnp.where(_any_nan(action_std), 0.1, action_std)
    value = jnp.where(_any_nan(value), 0.0, value)

    # --- single lane-dense store of the packed output slab ---
    pad = jnp.zeros((out_ref.shape[0], OUT_LANES - 2 * act - 1), f32)
    out_ref[...] = jnp.concatenate([action_mean, action_std, value, pad], axis=-1)


@functools.partial(jax.jit, static_argnames=("act_size",))
def market_aware_ppo_forward(obs, market_lags, w_packed, v_packed, act_size):
    B, ext = obs.shape
    lag = market_lags.shape[1]
    assert 2 * act_size + 1 <= OUT_LANES

    # bf16 inputs: halves input DMA bytes and removes per-use f32->bf16 casts.
    obs = obs.astype(jnp.bfloat16)
    lags = market_lags.astype(jnp.bfloat16)

    # Batch tiling: big tiles to amortize per-step overhead, padded (never tb=B
    # fallback with odd sublanes), and >=2 tiles when B allows so the "parallel"
    # batch axis can shard across v7x's two TensorCores.
    bp = _rup(B, 8)
    if bp >= 16:
        tb = min(TB_MAX, _rup(bp // 2, 8))
    else:
        tb = bp
    b_pad = _rup(bp, tb)
    if b_pad != B:
        obs = jnp.pad(obs, ((0, b_pad - B), (0, 0)))
        lags = jnp.pad(lags, ((0, b_pad - B), (0, 0)))

    kernel = functools.partial(ppo_kernel, ext=ext, lag=lag, act=act_size)
    out = pl.pallas_call(
        kernel,
        out_shape=jax.ShapeDtypeStruct((b_pad, OUT_LANES), jnp.float32),
        grid=(b_pad // tb,),
        in_specs=[
            pl.BlockSpec((tb, ext), lambda i: (i, 0)),
            pl.BlockSpec((tb, lag), lambda i: (i, 0)),
            pl.BlockSpec(w_packed.shape, lambda i: (0, 0)),   # weights resident
            pl.BlockSpec(v_packed.shape, lambda i: (0, 0)),   # vectors resident
        ],
        out_specs=pl.BlockSpec((tb, OUT_LANES), lambda i: (i, 0)),
        compiler_params=pltpu.CompilerParams(dimension_semantics=("parallel",)),
    )(obs, lags, w_packed, v_packed)

    action_mean = out[:B, :act_size]
    action_std = out[:B, act_size:2 * act_size]
    value = out[:B, 2 * act_size:2 * act_size + 1]
    return action_mean, action_std, value


def init_params(key, ext_obs, act_size, lag_dim, hidden=HIDDEN):
    """Synthetic parameters following the module __init__ shapes (weights (in,out))."""
    half = hidden // 2
    ks = iter(jax.random.split(key, 40))

    def lin(fi, fo):
        w = jax.random.normal(next(ks), (fi, fo), jnp.float32) / jnp.sqrt(fi)
        b = 0.1 * jax.random.normal(next(ks), (1, fo), jnp.float32)
        return w, b

    def lnorm(f):
        g = 1.0 + 0.1 * jax.random.normal(next(ks), (1, f), jnp.float32)
        b = 0.1 * jax.random.normal(next(ks), (1, f), jnp.float32)
        return g, b

    params = []
    w, b = lin(lag_dim, half); g, be = lnorm(half); params += [w, b, g, be]
    w, b = lin(ext_obs, hidden); g, be = lnorm(hidden); params += [w, b, g, be]
    params += list(lin(hidden, hidden))          # feature extractor L2
    params += list(lin(hidden, hidden))          # attention v_proj
    params += list(lin(hidden, hidden))          # attention out_proj
    params += list(lin(hidden + half, half))     # actor L1
    params += list(lin(half, act_size))          # actor L2
    params += list(lin(hidden + half, half))     # value1 L1
    params += [jax.random.normal(next(ks), (1, half), jnp.float32) / jnp.sqrt(half),
               0.1 * jax.random.normal(next(ks), (1, 1), jnp.float32)]
    params += list(lin(hidden + half, half))     # value2 L1
    params += [jax.random.normal(next(ks), (1, half), jnp.float32) / jnp.sqrt(half),
               0.1 * jax.random.normal(next(ks), (1, 1), jnp.float32)]
    params.append(jnp.log(0.1 * jnp.ones((1, act_size), jnp.float32))
                  + 0.05 * jax.random.normal(next(ks), (1, act_size), jnp.float32))
    params += list(lin(half, act_size))          # std conditioner
    return params


def pack_params(params, act_size, hidden=HIDDEN):
    """One-time (outside the hot path) fusion + packing into the two kernel slabs."""
    half = hidden // 2
    (w_me, b_me, g_me, be_me, w_f1, b_f1, g_f1, be_f1, w_f2, b_f2,
     w_v, b_v, w_o, b_o, w_a1, b_a1, w_a2, b_a2,
     w_v1a, b_v1a, w_v1b, b_v1b, w_v2a, b_v2a, w_v2b, b_v2b,
     log_std, w_std, b_std) = params
    ext = w_f1.shape[0]
    lag = w_me.shape[0]

    def zrows(r):
        return jnp.zeros((r, LANES), jnp.float32)

    def zrow():
        return jnp.zeros((1, LANES), jnp.float32)

    bn_scale = 1.0 / (1.0 + EPS) ** 0.5              # BatchNorm eval (running stats)
    eye = jnp.eye(half, dtype=jnp.float32)

    # block 1a/1b: fused first layer (obs -> [0:hid), lags -> [hid:hid+half))
    w1a = zrows(_rup(ext, 16)).at[:ext, :hidden].set(w_f1 * bn_scale)
    w1b = zrows(_rup(lag, 16)).at[:lag, hidden:hidden + half].set(w_me)
    # block 2: feature-extractor L2; market lanes carried through identity
    w2 = zrows(LANES).at[:hidden, :hidden].set(w_f2)
    w2 = w2.at[hidden:hidden + half, hidden:hidden + half].set(eye)
    # block 3: folded length-1 attention out_proj(v_proj(.)); market carried
    w_att = w_v @ w_o
    b_att = b_v @ w_o + b_o
    w3 = zrows(LANES).at[:hidden, :hidden].set(w_att)
    w3 = w3.at[hidden:hidden + half, hidden:hidden + half].set(eye)
    # block 4: fused heads L1 (actor | value1 | value2) + std conditioner
    w4 = zrows(LANES)
    w4 = w4.at[:hidden, 0:half].set(w_a1[:hidden])
    w4 = w4.at[:hidden, half:2 * half].set(w_v1a[:hidden])
    w4 = w4.at[:hidden, 2 * half:3 * half].set(w_v2a[:hidden])
    w4 = w4.at[hidden:hidden + half, 0:half].set(w_a1[hidden:])
    w4 = w4.at[hidden:hidden + half, half:2 * half].set(w_v1a[hidden:])
    w4 = w4.at[hidden:hidden + half, 2 * half:3 * half].set(w_v2a[hidden:])
    w4 = w4.at[hidden:hidden + half, 3 * half:3 * half + act_size].set(w_std)
    # block 5: fused final layer (actor L2 | value1 L2 | value2 L2)
    w5 = zrows(LANES)
    w5 = w5.at[0:half, 0:act_size].set(w_a2)
    w5 = w5.at[half:2 * half, act_size].set(w_v1b[0])
    w5 = w5.at[2 * half:3 * half, act_size + 1].set(w_v2b[0])

    w_packed = jnp.concatenate([w1a, w1b, w2, w3, w4, w5], axis=0).astype(jnp.bfloat16)

    b1 = zrow().at[:, :hidden].set(b_f1).at[:, hidden:hidden + half].set(b_me)
    g1 = zrow().at[:, :hidden].set(g_f1).at[:, hidden:hidden + half].set(g_me)
    be1 = zrow().at[:, :hidden].set(be_f1).at[:, hidden:hidden + half].set(be_me)
    b2 = zrow().at[:, :hidden].set(b_f2)
    b3 = zrow().at[:, :hidden].set(b_att)
    b4 = (zrow().at[:, 0:half].set(b_a1).at[:, half:2 * half].set(b_v1a)
               .at[:, 2 * half:3 * half].set(b_v2a)
               .at[:, 3 * half:3 * half + act_size].set(b_std))
    b5 = (zrow().at[:, 0:act_size].set(b_a2)
               .at[:, act_size].set(b_v1b[0, 0])
               .at[:, act_size + 1].set(b_v2b[0, 0]))
    sbase = zrow().at[:, :act_size].set(jnp.exp(log_std))
    v_packed = jnp.concatenate([b1, g1, be1, b2, b3, b4, b5, sbase], axis=0)  # 8 rows
    return w_packed, v_packed.astype(jnp.float32)


def reference_forward(obs, lags, params):
    """Original (unfused) algebra; matmul operands in bf16 to mirror kernel precision."""
    (w_me, b_me, g_me, be_me, w_f1, b_f1, g_f1, be_f1, w_f2, b_f2,
     w_v, b_v, w_o, b_o, w_a1, b_a1, w_a2, b_a2,
     w_v1a, b_v1a, w_v1b, b_v1b, w_v2a, b_v2a, w_v2b, b_v2b,
     log_std, w_std, b_std) = params
    bf16 = jnp.bfloat16

    def mm(x, w):
        return jnp.dot(x.astype(bf16), w.astype(bf16), preferred_element_type=jnp.float32)

    def ln(x, g, b):
        mu = x.mean(-1, keepdims=True)
        var = ((x - mu) ** 2).mean(-1, keepdims=True)
        return (x - mu) * jax.lax.rsqrt(var + EPS) * g + b

    obs_norm = obs * (1.0 / (1.0 + EPS) ** 0.5)
    mkt = jnp.maximum(ln(mm(lags, w_me) + b_me, g_me, be_me), 0.0)
    h = jnp.maximum(ln(mm(obs_norm, w_f1) + b_f1, g_f1, be_f1), 0.0)
    h = jnp.maximum(mm(h, w_f2) + b_f2, 0.0)
    att = mm(mm(h, w_v) + b_v, w_o) + b_o
    comb = jnp.concatenate([att, mkt], axis=-1)
    mean = jnp.tanh(mm(jnp.maximum(mm(comb, w_a1) + b_a1, 0.0), w_a2) + b_a2)
    std = jnp.clip(jnp.exp(log_std) * (0.5 + jax.nn.sigmoid(mm(mkt, w_std) + b_std)), 0.01, 1.0)
    v1 = mm(jnp.maximum(mm(comb, w_v1a) + b_v1a, 0.0), w_v1b.T) + b_v1b
    v2 = mm(jnp.maximum(mm(comb, w_v2a) + b_v2a, 0.0), w_v2b.T) + b_v2b
    return mean, std, jnp.minimum(v1, v2)


if __name__ == "__main__":
    obs_size = 26
    act_size = 8
    lag_window = 8
    lag_dim = lag_window * 4                  # lag_features = 4 -> 32
    ext_obs = obs_size + lag_dim + 6          # extended_obs_size -> 64
    B = 8

    key = jax.random.PRNGKey(0)
    k_obs, k_lag, k_par = jax.random.split(key, 3)
    obs = jax.random.normal(k_obs, (B, ext_obs), jnp.float32)
    market_lags = jax.random.normal(k_lag, (B, lag_dim), jnp.float32)
    params = init_params(k_par, ext_obs, act_size, lag_dim)
    w_packed, v_packed = pack_params(params, act_size)

    action_mean, action_std, value = market_aware_ppo_forward(
        obs, market_lags, w_packed, v_packed, act_size)
    jax.block_until_ready((action_mean, action_std, value))

    rm, rs, rv = reference_forward(obs, market_lags, params)
    assert action_mean.shape == (B, act_size)
    assert action_std.shape == (B, act_size)
    assert value.shape == (B, 1)
    # Tolerance covers bf16 rounding of the folded/fused weights vs. the unfused
    # reference; structural bugs would produce O(1) mismatches.
    assert jnp.allclose(action_mean, rm, atol=3e-2, rtol=3e-2)
    assert jnp.allclose(action_std, rs, atol=3e-2, rtol=3e-2)
    assert jnp.allclose(value, rv, atol=3e-2, rtol=3e-2)
    print("KERNEL_OK")
</pallas_src>

<mosaic_0001>
module attributes {stable_mosaic.version = 11 : i64} {
  func.func @ppo_kernel(%arg0: i32, %arg1: memref<8x64xbf16, #tpu.memory_space<vmem>>, %arg2: memref<8x32xbf16, #tpu.memory_space<vmem>>, %arg3: memref<1120x256xbf16, #tpu.memory_space<vmem>>, %arg4: memref<8x256xf32, #tpu.memory_space<vmem>>, %arg5: memref<8x128xf32, #tpu.memory_space<vmem>>) attributes {dimension_semantics = [#tpu.dimension_semantics<parallel>], iteration_bounds = array<i64: 1>, scalar_prefetch = 0 : i64, scratch_operands = 0 : i64, tpu.core_type = #tpu.core_type<tc>, window_params = [{transform_indices = @transform_0, window_bounds = array<i64: 8, 64>}, {transform_indices = @transform_1, window_bounds = array<i64: 8, 32>}, {pipeline_mode = #tpu.pipeline_mode<synchronous>, transform_indices = @transform_2, window_bounds = array<i64: 1120, 256>}, {pipeline_mode = #tpu.pipeline_mode<synchronous>, transform_indices = @transform_3, window_bounds = array<i64: 8, 256>}, {transform_indices = @transform_4, window_bounds = array<i64: 8, 128>}]} {
    %c0 = arith.constant 0 : index
    %c0_0 = arith.constant 0 : index
    %0 = vector.load %arg1[%c0, %c0_0] : memref<8x64xbf16, #tpu.memory_space<vmem>>, vector<8x64xbf16>
    %c0_1 = arith.constant 0 : index
    %c0_2 = arith.constant 0 : index
    %1 = vector.load %arg2[%c0_1, %c0_2] : memref<8x32xbf16, #tpu.memory_space<vmem>>, vector<8x32xbf16>
    %2 = arith.cmpf one, %0, %0 : vector<8x64xbf16>
    %cst = arith.constant 1.000000e+00 : f32
    %cst_3 = arith.constant 0.000000e+00 : f32
    %3 = vector.broadcast %cst : f32 to vector<8x64xf32>
    %4 = vector.broadcast %cst_3 : f32 to vector<8x64xf32>
    %5 = arith.select %2, %3, %4 : vector<8x64xi1>, vector<8x64xf32>
    %6 = vector.shape_cast %5 : vector<8x64xf32> to vector<1x8x64xf32>
    %cst_4 = arith.constant dense<0xFF800000> : vector<1xf32>
    %7 = vector.multi_reduction <maximumf>, %6, %cst_4 [1, 2] : vector<1x8x64xf32> to vector<1xf32>
    %8 = vector.shape_cast %7 : vector<1xf32> to vector<1x1x1xf32>
    %9 = vector.extract %8[0, 0, 0] : f32 from vector<1x1x1xf32>
    %cst_5 = arith.constant 0.000000e+00 : f32
    %10 = arith.cmpf ogt, %9, %cst_5 : f32
    %11 = arith.cmpf one, %0, %0 : vector<8x64xbf16>
    %cst_6 = arith.constant 0.000000e+00 : bf16
    %12 = vector.broadcast %cst_6 : bf16 to vector<8x64xbf16>
    %13 = arith.select %11, %12, %0 : vector<8x64xi1>, vector<8x64xbf16>
    %cst_7 = arith.constant 0x7F80 : bf16
    %14 = vector.broadcast %cst_7 : bf16 to vector<8x64xbf16>
    %15 = arith.cmpf oeq, %13, %14 : vector<8x64xbf16>
    %cst_8 = arith.constant 3.389530e+38 : bf16
    %16 = vector.broadcast %cst_8 : bf16 to vector<8x64xbf16>
    %17 = arith.select %15, %16, %13 : vector<8x64xi1>, vector<8x64xbf16>
    %cst_9 = arith.constant 0xFF80 : bf16
    %18 = vector.broadcast %cst_9 : bf16 to vector<8x64xbf16>
    %19 = arith.cmpf oeq, %17, %18 : vector<8x64xbf16>
    %cst_10 = arith.constant -3.389530e+38 : bf16
    %20 = vector.broadcast %cst_10 : bf16 to vector<8x64xbf16>
    %21 = arith.select %19, %20, %17 : vector<8x64xi1>, vector<8x64xbf16>
    %22 = arith.select %10, %21, %0 : vector<8x64xbf16>
    %23 = arith.cmpf one, %1, %1 : vector<8x32xbf16>
    %cst_11 = arith.constant 1.000000e+00 : f32
    %cst_12 = arith.constant 0.000000e+00 : f32
    %24 = vector.broadcast %cst_11 : f32 to vector<8x32xf32>
    %25 = vector.broadcast %cst_12 : f32 to vector<8x32xf32>
    %26 = arith.select %23, %24, %25 : vector<8x32xi1>, vector<8x32xf32>
    %27 = vector.shape_cast %26 : vector<8x32xf32> to vector<1x8x32xf32>
    %cst_13 = arith.constant dense<0xFF800000> : vector<1xf32>
    %28 = vector.multi_reduction <maximumf>, %27, %cst_13 [1, 2] : vector<1x8x32xf32> to vector<1xf32>
    %29 = vector.shape_cast %28 : vector<1xf32> to vector<1x1x1xf32>
    %30 = vector.extract %29[0, 0, 0] : f32 from vector<1x1x1xf32>
    %cst_14 = arith.constant 0.000000e+00 : f32
    %31 = arith.cmpf ogt, %30, %cst_14 : f32
    %32 = arith.cmpf one, %1, %1 : vector<8x32xbf16>
    %cst_15 = arith.constant 0.000000e+00 : bf16
    %33 = vector.broadcast %cst_15 : bf16 to vector<8x32xbf16>
    %34 = arith.select %32, %33, %1 : vector<8x32xi1>, vector<8x32xbf16>
    %cst_16 = arith.constant 0x7F80 : bf16
    %35 = vector.broadcast %cst_16 : bf16 to vector<8x32xbf16>
    %36 = arith.cmpf oeq, %34, %35 : vector<8x32xbf16>
    %cst_17 = arith.constant 3.389530e+38 : bf16
    %37 = vector.broadcast %cst_17 : bf16 to vector<8x32xbf16>
    %38 = arith.select %36, %37, %34 : vector<8x32xi1>, vector<8x32xbf16>
    %cst_18 = arith.constant 0xFF80 : bf16
    %39 = vector.broadcast %cst_18 : bf16 to vector<8x32xbf16>
    %40 = arith.cmpf oeq, %38, %39 : vector<8x32xbf16>
    %cst_19 = arith.constant -3.389530e+38 : bf16
    %41 = vector.broadcast %cst_19 : bf16 to vector<8x32xbf16>
    %42 = arith.select %40, %41, %38 : vector<8x32xi1>, vector<8x32xbf16>
    %43 = arith.select %31, %42, %1 : vector<8x32xbf16>
    %c0_20 = arith.constant 0 : index
    %c0_21 = arith.constant 0 : index
    %44 = vector.load %arg3[%c0_20, %c0_21] : memref<1120x256xbf16, #tpu.memory_space<vmem>>, vector<64x256xbf16>
    %cst_22 = arith.constant dense<0.000000e+00> : vector<8x256xf32>
    %45 = tpu.matmul %22, %44, %cst_22 {dimension_numbers = #tpu.dot_dimension_numbers<[1], [0], [0], [1], [0, 0, 1, 1], [], []>} : vector<8x64xbf16>, vector<64x256xbf16>, vector<8x256xf32> -> vector<8x256xf32>
    %c64 = arith.constant 64 : index
    %c0_23 = arith.constant 0 : index
    %46 = vector.load %arg3[%c64, %c0_23] : memref<1120x256xbf16, #tpu.memory_space<vmem>>, vector<32x256xbf16>
    %cst_24 = arith.constant dense<0.000000e+00> : vector<8x256xf32>
    %47 = tpu.matmul %43, %46, %cst_24 {dimension_numbers = #tpu.dot_dimension_numbers<[1], [0], [0], [1], [0, 0, 1, 1], [], []>} : vector<8x32xbf16>, vector<32x256xbf16>, vector<8x256xf32> -> vector<8x256xf32>
    %48 = arith.addf %45, %47 : vector<8x256xf32>
    %c0_25 = arith.constant 0 : index
    %c0_26 = arith.constant 0 : index
    %49 = vector.load %arg4[%c0_25, %c0_26] : memref<8x256xf32, #tpu.memory_space<vmem>>, vector<1x256xf32>
    %50 = vector.broadcast %49 : vector<1x256xf32> to vector<8x256xf32>
    %51 = arith.addf %48, %50 : vector<8x256xf32>
    %52 = tpu.iota {dimensions = array<i32: 1>} : vector<1x256xi32>
    %c128_i32 = arith.constant 128 : i32
    %53 = vector.broadcast %c128_i32 : i32 to vector<1x256xi32>
    %54 = arith.cmpi slt, %52, %53 : vector<1x256xi32>
    %55 = arith.extui %54 : vector<1x256xi1> to vector<1x256xi32>
    %56 = arith.sitofp %55 : vector<1x256xi32> to vector<1x256xf32>
    %c128_i32_27 = arith.constant 128 : i32
    %57 = vector.broadcast %c128_i32_27 : i32 to vector<1x256xi32>
    %58 = arith.cmpi sge, %52, %57 : vector<1x256xi32>
    %c192_i32 = arith.constant 192 : i32
    %59 = vector.broadcast %c192_i32 : i32 to vector<1x256xi32>
    %60 = arith.cmpi slt, %52, %59 : vector<1x256xi32>
    %61 = arith.andi %58, %60 : vector<1x256xi1>
    %62 = arith.extui %61 : vector<1x256xi1> to vector<1x256xi32>
    %63 = arith.sitofp %62 : vector<1x256xi32> to vector<1x256xf32>
    %64 = vector.broadcast %56 : vector<1x256xf32> to vector<8x256xf32>
    %65 = arith.mulf %51, %64 : vector<8x256xf32>
    %cst_28 = arith.constant dense<0.000000e+00> : vector<8xf32>
    %66 = vector.multi_reduction <add>, %65, %cst_28 [1] : vector<8x256xf32> to vector<8xf32>
    %67 = vector.shape_cast %66 : vector<8xf32> to vector<8x1xf32>
    %cst_29 = arith.constant 7.812500e-03 : f32
    %68 = vector.broadcast %cst_29 : f32 to vector<8x1xf32>
    %69 = arith.mulf %67, %68 : vector<8x1xf32>
    %70 = vector.broadcast %69 : vector<8x1xf32> to vector<8x256xf32>
    %71 = vector.broadcast %56 : vector<1x256xf32> to vector<8x256xf32>
    %72 = arith.mulf %70, %71 : vector<8x256xf32>
    %73 = vector.broadcast %63 : vector<1x256xf32> to vector<8x256xf32>
    %74 = arith.mulf %51, %73 : vector<8x256xf32>
    %cst_30 = arith.constant dense<0.000000e+00> : vector<8xf32>
    %75 = vector.multi_reduction <add>, %74, %cst_30 [1] : vector<8x256xf32> to vector<8xf32>
    %76 = vector.shape_cast %75 : vector<8xf32> to vector<8x1xf32>
    %cst_31 = arith.constant 1.562500e-02 : f32
    %77 = vector.broadcast %cst_31 : f32 to vector<8x1xf32>
    %78 = arith.mulf %76, %77 : vector<8x1xf32>
    %79 = vector.broadcast %78 : vector<8x1xf32> to vector<8x256xf32>
    %80 = vector.broadcast %63 : vector<1x256xf32> to vector<8x256xf32>
    %81 = arith.mulf %79, %80 : vector<8x256xf32>
    %82 = arith.addf %72, %81 : vector<8x256xf32>
    %83 = arith.subf %51, %82 : vector<8x256xf32>
    %84 = arith.mulf %83, %83 : vector<8x256xf32>
    %85 = vector.broadcast %56 : vector<1x256xf32> to vector<8x256xf32>
    %86 = arith.mulf %84, %85 : vector<8x256xf32>
    %cst_32 = arith.constant dense<0.000000e+00> : vector<8xf32>
    %87 = vector.multi_reduction <add>, %86, %cst_32 [1] : vector<8x256xf32> to vector<8xf32>
    %88 = vector.shape_cast %87 : vector<8xf32> to vector<8x1xf32>
    %cst_33 = arith.constant 7.812500e-03 : f32
    %89 = vector.broadcast %cst_33 : f32 to vector<8x1xf32>
    %90 = arith.mulf %88, %89 : vector<8x1xf32>
    %cst_34 = arith.constant 9.99999974E-6 : f32
    %91 = vector.broadcast %cst_34 : f32 to vector<8x1xf32>
    %92 = arith.addf %90, %91 : vector<8x1xf32>
    %93 = math.rsqrt %92 : vector<8x1xf32>
    %94 = vector.broadcast %93 : vector<8x1xf32> to vector<8x256xf32>
    %95 = vector.broadcast %56 : vector<1x256xf32> to vector<8x256xf32>
    %96 = arith.mulf %94, %95 : vector<8x256xf32>
    %97 = vector.broadcast %63 : vector<1x256xf32> to vector<8x256xf32>
    %98 = arith.mulf %84, %97 : vector<8x256xf32>
    %cst_35 = arith.constant dense<0.000000e+00> : vector<8xf32>
    %99 = vector.multi_reduction <add>, %98, %cst_35 [1] : vector<8x256xf32> to vector<8xf32>
    %100 = vector.shape_cast %99 : vector<8xf32> to vector<8x1xf32>
    %cst_36 = arith.constant 1.562500e-02 : f32
    %101 = vector.broadcast %cst_36 : f32 to vector<8x1xf32>
    %102 = arith.mulf %100, %101 : vector<8x1xf32>
    %cst_37 = arith.constant 9.99999974E-6 : f32
    %103 = vector.broadcast %cst_37 : f32 to vector<8x1xf32>
    %104 = arith.addf %102, %103 : vector<8x1xf32>
    %105 = math.rsqrt %104 : vector<8x1xf32>
    %106 = vector.broadcast %105 : vector<8x1xf32> to vector<8x256xf32>
    %107 = vector.broadcast %63 : vector<1x256xf32> to vector<8x256xf32>
    %108 = arith.mulf %106, %107 : vector<8x256xf32>
    %109 = arith.addf %96, %108 : vector<8x256xf32>
    %110 = arith.mulf %83, %109 : vector<8x256xf32>
    %c1 = arith.constant 1 : index
    %c0_38 = arith.constant 0 : index
    %111 = vector.load %arg4[%c1, %c0_38] : memref<8x256xf32, #tpu.memory_space<vmem>>, vector<1x256xf32>
    %112 = vector.broadcast %111 : vector<1x256xf32> to vector<8x256xf32>
    %113 = arith.mulf %110, %112 : vector<8x256xf32>
    %c2 = arith.constant 2 : index
    %c0_39 = arith.constant 0 : index
    %114 = vector.load %arg4[%c2, %c0_39] : memref<8x256xf32, #tpu.memory_space<vmem>>, vector<1x256xf32>
    %115 = vector.broadcast %114 : vector<1x256xf32> to vector<8x256xf32>
    %116 = arith.addf %113, %115 : vector<8x256xf32>
    %cst_40 = arith.constant 0.000000e+00 : f32
    %117 = vector.broadcast %cst_40 : f32 to vector<8x256xf32>
    %118 = arith.maximumf %116, %117 : vector<8x256xf32>
    %119 = arith.truncf %118 : vector<8x256xf32> to vector<8x256xbf16>
    %c96 = arith.constant 96 : index
    %c0_41 = arith.constant 0 : index
    %120 = vector.load %arg3[%c96, %c0_41] : memref<1120x256xbf16, #tpu.memory_space<vmem>>, vector<256x256xbf16>
    %cst_42 = arith.constant dense<0.000000e+00> : vector<8x256xf32>
    %121 = tpu.matmul %119, %120, %cst_42 {dimension_numbers = #tpu.dot_dimension_numbers<[1], [0], [0], [1], [0, 0, 1, 1], [], []>} : vector<8x256xbf16>, vector<256x256xbf16>, vector<8x256xf32> -> vector<8x256xf32>
    %c3 = arith.constant 3 : index
    %c0_43 = arith.constant 0 : index
    %122 = vector.load %arg4[%c3, %c0_43] : memref<8x256xf32, #tpu.memory_space<vmem>>, vector<1x256xf32>
    %123 = vector.broadcast %122 : vector<1x256xf32> to vector<8x256xf32>
    %124 = arith.addf %121, %123 : vector<8x256xf32>
    %cst_44 = arith.constant 0.000000e+00 : f32
    %125 = vector.broadcast %cst_44 : f32 to vector<8x256xf32>
    %126 = arith.maximumf %124, %125 : vector<8x256xf32>
    %127 = arith.truncf %126 : vector<8x256xf32> to vector<8x256xbf16>
    %c352 = arith.constant 352 : index
    %c0_45 = arith.constant 0 : index
    %128 = vector.load %arg3[%c352, %c0_45] : memref<1120x256xbf16, #tpu.memory_space<vmem>>, vector<256x256xbf16>
    %cst_46 = arith.constant dense<0.000000e+00> : vector<8x256xf32>
    %129 = tpu.matmul %127, %128, %cst_46 {dimension_numbers = #tpu.dot_dimension_numbers<[1], [0], [0], [1], [0, 0, 1, 1], [], []>} : vector<8x256xbf16>, vector<256x256xbf16>, vector<8x256xf32> -> vector<8x256xf32>
    %c4 = arith.constant 4 : index
    %c0_47 = arith.constant 0 : index
    %130 = vector.load %arg4[%c4, %c0_47] : memref<8x256xf32, #tpu.memory_space<vmem>>, vector<1x256xf32>
    %131 = vector.broadcast %130 : vector<1x256xf32> to vector<8x256xf32>
    %132 = arith.addf %129, %131 : vector<8x256xf32>
    %133 = arith.truncf %132 : vector<8x256xf32> to vector<8x256xbf16>
    %c608 = arith.constant 608 : index
    %c0_48 = arith.constant 0 : index
    %134 = vector.load %arg3[%c608, %c0_48] : memref<1120x256xbf16, #tpu.memory_space<vmem>>, vector<256x256xbf16>
    %cst_49 = arith.constant dense<0.000000e+00> : vector<8x256xf32>
    %135 = tpu.matmul %133, %134, %cst_49 {dimension_numbers = #tpu.dot_dimension_numbers<[1], [0], [0], [1], [0, 0, 1, 1], [], []>} : vector<8x256xbf16>, vector<256x256xbf16>, vector<8x256xf32> -> vector<8x256xf32>
    %c5 = arith.constant 5 : index
    %c0_50 = arith.constant 0 : index
    %136 = vector.load %arg4[%c5, %c0_50] : memref<8x256xf32, #tpu.memory_space<vmem>>, vector<1x256xf32>
    %137 = vector.broadcast %136 : vector<1x256xf32> to vector<8x256xf32>
    %138 = arith.addf %135, %137 : vector<8x256xf32>
    %139 = vector.extract_strided_slice %138 {offsets = [0, 192], sizes = [8, 8], strides = [1, 1]} : vector<8x256xf32> to vector<8x8xf32>
    %cst_51 = arith.constant 0.000000e+00 : f32
    %140 = vector.broadcast %cst_51 : f32 to vector<8x256xf32>
    %141 = arith.maximumf %138, %140 : vector<8x256xf32>
    %142 = arith.truncf %141 : vector<8x256xf32> to vector<8x256xbf16>
    %c864 = arith.constant 864 : index
    %c0_52 = arith.constant 0 : index
    %143 = vector.load %arg3[%c864, %c0_52] : memref<1120x256xbf16, #tpu.memory_space<vmem>>, vector<256x256xbf16>
    %cst_53 = arith.constant dense<0.000000e+00> : vector<8x256xf32>
    %144 = tpu.matmul %142, %143, %cst_53 {dimension_numbers = #tpu.dot_dimension_numbers<[1], [0], [0], [1], [0, 0, 1, 1], [], []>} : vector<8x256xbf16>, vector<256x256xbf16>, vector<8x256xf32> -> vector<8x256xf32>
    %c6 = arith.constant 6 : index
    %c0_54 = arith.constant 0 : index
    %145 = vector.load %arg4[%c6, %c0_54] : memref<8x256xf32, #tpu.memory_space<vmem>>, vector<1x256xf32>
    %146 = vector.broadcast %145 : vector<1x256xf32> to vector<8x256xf32>
    %147 = arith.addf %144, %146 : vector<8x256xf32>
    %148 = vector.extract_strided_slice %147 {offsets = [0, 0], sizes = [8, 8], strides = [1, 1]} : vector<8x256xf32> to vector<8x8xf32>
    %149 = math.tanh %148 : vector<8x8xf32>
    %150 = vector.extract_strided_slice %147 {offsets = [0, 8], sizes = [8, 1], strides = [1, 1]} : vector<8x256xf32> to vector<8x1xf32>
    %151 = vector.extract_strided_slice %147 {offsets = [0, 9], sizes = [8, 1], strides = [1, 1]} : vector<8x256xf32> to vector<8x1xf32>
    %152 = arith.minimumf %150, %151 : vector<8x1xf32>
    %c7 = arith.constant 7 : index
    %c0_55 = arith.constant 0 : index
    %153 = vector.load %arg4[%c7, %c0_55] : memref<8x256xf32, #tpu.memory_space<vmem>>, vector<1x256xf32>
    %154 = vector.extract_strided_slice %153 {offsets = [0, 0], sizes = [1, 8], strides = [1, 1]} : vector<1x256xf32> to vector<1x8xf32>
    %155 = arith.negf %139 : vector<8x8xf32>
    %156 = math.exp %155 : vector<8x8xf32>
    %cst_56 = arith.constant 1.000000e+00 : f32
    %157 = vector.broadcast %cst_56 : f32 to vector<8x8xf32>
    %158 = arith.addf %157, %156 : vector<8x8xf32>
    %159 = arith.divf %157, %158 : vector<8x8xf32>
    %cst_57 = arith.constant 5.000000e-01 : f32
    %160 = vector.broadcast %cst_57 : f32 to vector<8x8xf32>
    %161 = arith.addf %160, %159 : vector<8x8xf32>
    %162 = vector.broadcast %154 : vector<1x8xf32> to vector<8x8xf32>
    %163 = arith.mulf %162, %161 : vector<8x8xf32>
    %cst_58 = arith.constant 0.00999999977 : f32
    %cst_59 = arith.constant 1.000000e+00 : f32
    %164 = vector.broadcast %cst_58 : f32 to vector<8x8xf32>
    %165 = arith.maximumf %164, %163 : vector<8x8xf32>
    %166 = vector.broadcast %cst_59 : f32 to vector<8x8xf32>
    %167 = arith.minimumf %166, %165 : vector<8x8xf32>
    %168 = arith.cmpf one, %149, %149 : vector<8x8xf32>
    %cst_60 = arith.constant 1.000000e+00 : f32
    %cst_61 = arith.constant 0.000000e+00 : f32
    %169 = vector.broadcast %cst_60 : f32 to vector<8x8xf32>
    %170 = vector.broadcast %cst_61 : f32 to vector<8x8xf32>
    %171 = arith.select %168, %169, %170 : vector<8x8xi1>, vector<8x8xf32>
    %172 = vector.shape_cast %171 : vector<8x8xf32> to vector<1x8x8xf32>
    %cst_62 = arith.constant dense<0xFF800000> : vector<1xf32>
    %173 = vector.multi_reduction <maximumf>, %172, %cst_62 [1, 2] : vector<1x8x8xf32> to vector<1xf32>
    %174 = vector.shape_cast %173 : vector<1xf32> to vector<1x1x1xf32>
    %175 = vector.extract %174[0, 0, 0] : f32 from vector<1x1x1xf32>
    %cst_63 = arith.constant 0.000000e+00 : f32
    %176 = arith.cmpf ogt, %175, %cst_63 : f32
    %cst_64 = arith.constant 0.000000e+00 : f32
    %177 = vector.broadcast %cst_64 : f32 to vector<8x8xf32>
    %178 = arith.select %176, %177, %149 : vector<8x8xf32>
    %179 = arith.cmpf one, %167, %167 : vector<8x8xf32>
    %cst_65 = arith.constant 1.000000e+00 : f32
    %cst_66 = arith.constant 0.000000e+00 : f32
    %180 = vector.broadcast %cst_65 : f32 to vector<8x8xf32>
    %181 = vector.broadcast %cst_66 : f32 to vector<8x8xf32>
    %182 = arith.select %179, %180, %181 : vector<8x8xi1>, vector<8x8xf32>
    %183 = vector.shape_cast %182 : vector<8x8xf32> to vector<1x8x8xf32>
    %cst_67 = arith.constant dense<0xFF800000> : vector<1xf32>
    %184 = vector.multi_reduction <maximumf>, %183, %cst_67 [1, 2] : vector<1x8x8xf32> to vector<1xf32>
    %185 = vector.shape_cast %184 : vector<1xf32> to vector<1x1x1xf32>
    %186 = vector.extract %185[0, 0, 0] : f32 from vector<1x1x1xf32>
    %cst_68 = arith.constant 0.000000e+00 : f32
    %187 = arith.cmpf ogt, %186, %cst_68 : f32
    %cst_69 = arith.constant 1.000000e-01 : f32
    %188 = vector.broadcast %cst_69 : f32 to vector<8x8xf32>
    %189 = arith.select %187, %188, %167 : vector<8x8xf32>
    %190 = arith.cmpf one, %152, %152 : vector<8x1xf32>
    %cst_70 = arith.constant 1.000000e+00 : f32
    %cst_71 = arith.constant 0.000000e+00 : f32
    %191 = vector.broadcast %cst_70 : f32 to vector<8x1xf32>
    %192 = vector.broadcast %cst_71 : f32 to vector<8x1xf32>
    %193 = arith.select %190, %191, %192 : vector<8x1xi1>, vector<8x1xf32>
    %194 = vector.shape_cast %193 : vector<8x1xf32> to vector<1x8x1xf32>
    %cst_72 = arith.constant dense<0xFF800000> : vector<1xf32>
    %195 = vector.multi_reduction <maximumf>, %194, %cst_72 [1, 2] : vector<1x8x1xf32> to vector<1xf32>
    %196 = vector.shape_cast %195 : vector<1xf32> to vector<1x1x1xf32>
    %197 = vector.extract %196[0, 0, 0] : f32 from vector<1x1x1xf32>
    %cst_73 = arith.constant 0.000000e+00 : f32
    %198 = arith.cmpf ogt, %197, %cst_73 : f32
    %cst_74 = arith.constant 0.000000e+00 : f32
    %199 = vector.broadcast %cst_74 : f32 to vector<8x1xf32>
    %200 = arith.select %198, %199, %152 : vector<8x1xf32>
    %cst_75 = arith.constant 0.000000e+00 : f32
    %201 = vector.broadcast %cst_75 : f32 to vector<8x111xf32>
    %202 = tpu.concatenate %178, %189, %200, %201 in 1 : vector<8x8xf32>, vector<8x8xf32>, vector<8x1xf32>, vector<8x111xf32> -> vector<8x128xf32>
    %c0_76 = arith.constant 0 : index
    %c0_77 = arith.constant 0 : index
    %203 = vector.load %arg5[%c0_76, %c0_77] : memref<8x128xf32, #tpu.memory_space<vmem>>, vector<8x128xf32>
    tpu.vector_store %arg5[%c0_76, %c0_77], %202 {strides = array<i32>} : memref<8x128xf32, #tpu.memory_space<vmem>>, vector<8x128xf32>,
    return
  }
  func.func @transform_0(%arg0: i32) -> (i32, i32) {
    %c0_i32 = arith.constant 0 : i32
    %c0_i32_0 = arith.constant 0 : i32
    return %arg0, %c0_i32 : i32, i32
  }
  func.func @transform_1(%arg0: i32) -> (i32, i32) {
    %c0_i32 = arith.constant 0 : i32
    %c0_i32_0 = arith.constant 0 : i32
    return %arg0, %c0_i32 : i32, i32
  }
  func.func @transform_2(%arg0: i32) -> (i32, i32) {
    %c0_i32 = arith.constant 0 : i32
    %c0_i32_0 = arith.constant 0 : i32
    %c0_i32_1 = arith.constant 0 : i32
    return %c0_i32, %c0_i32_0 : i32, i32
  }
  func.func @transform_3(%arg0: i32) -> (i32, i32) {
    %c0_i32 = arith.constant 0 : i32
    %c0_i32_0 = arith.constant 0 : i32
    %c0_i32_1 = arith.constant 0 : i32
    return %c0_i32, %c0_i32_0 : i32, i32
  }
  func.func @transform_4(%arg0: i32) -> (i32, i32) {
    %c0_i32 = arith.constant 0 : i32
    %c0_i32_0 = arith.constant 0 : i32
    return %arg0, %c0_i32 : i32, i32
  }
}

</mosaic_0001>

<bundles_post_ra>
// kernel: market_aware_ppo_forward.1
= control target key start
LH: loop header
LB: loop body
LE: loop exit
PB: predicated region body
PF: predicated region fallthrough
CT: control target
= control target key end

     0   :  { %9 = vsyncpa [#allocation3], 0  ;;  %s2056_s18 = smov [#allocation2]   ;;  %s2057_s20 = smov 128   ;;  %s2218_s0 = inlined_call_operand.vmem [shape: bf16[8,64], index: 0, kind: input, shape index: {}]   ;;  %s2219_s1 = inlined_call_operand.vmem [shape: bf16[8,32], index: 1, kind: input, shape index: {}]   ;;  %s2220_s2 = inlined_call_operand.hbm [shape: bf16[1120,256], index: 2, kind: input, shape index: {}]   ;;  %s2221_s3 = inlined_call_operand.vmem [shape: f32[8,256], index: 3, kind: input, shape index: {}]   ;;  %s2222_s4 = inlined_call_operand.vmem [shape: f32[8,128], index: 4, kind: output, shape index: {}]  }
   0x1   :  { %s18_s17 = sshll.u32 %s2220_s2, 4  ;;  %s20_s19 = sshll.u32 %s2056_s18, 4  ;;  %s19_s17 = int_to_ptr.hbm [resolvable:$true] %s18_s17  ;;  %s21_s19 = int_to_ptr.vmem [resolvable:$true] %s20_s19 }
   0x2   :  { %s2058_s21 = smov 8  }
   0x3   :  { %26 = dma.hbm_to_vmem [thread:$0]  %s19_s17, 17920, %s21_s19, [#allocation3], %s2057_s20, %s2057_s20, %s2058_s21  }
   0x4   :  { %2054 = dma.done.wait [#allocation3], 17920  }
   0x5   :  { %2055 = vsyncadd [#allocation3], 4294949376  ;;  %v2094_v0 = vld [vmem:[%s2218_s0] sm:$0xf]  ;;  %vm41_vm0 = vcmask 523264   ;;  %v2059_v5 = vmov 0.0  }
   0x6   :  { %v2099_v1 = vld [vmem:[%s2219_s1] sm:$0xf]  ;;  %v38_v2 = vunpack.c.l.bf16 %v2094_v0  ;;  %vm70_vm3 = vcmask 261120   ;;  %v1381_v25 = vld [vmem:[#allocation2 + $0x50] sm:$0xf]  ;;  %s2060_s13 = smov 64  }
   0x7   :  { %v67_v3 = vunpack.c.l.bf16 %v2099_v1  ;;  %v1891_v26 = vld [vmem:[#allocation2 + $0x54] sm:$0xf0]  ;;  %v1890_v27 = vld [vmem:[#allocation2 + $0x54] sm:$0xf]  ;;  %v1383_v29 = vld [vmem:[#allocation2 + $0x58] sm:$0xf0] }
   0x8   :  { %vm2103_vm1 = vcmp.ne.f32.partialorder %v38_v2, %v38_v2  ;;  %v1382_v28 = vor.u32 %v1891_v26, %v1381_v25  ;;  %v1386_v30 = vor.u32 %v1890_v27, %v1383_v29  ;;  %v1373_v31 = vld [vmem:[#allocation2 + $0x40] sm:$0xf]  ;;  %v1889_v32 = vld [vmem:[#allocation2 + $0x44] sm:$0xf0]  ;;  %v1888_v33 = vld [vmem:[#allocation2 + $0x44] sm:$0xf] }
   0x9   :  { %v40_v6 = vsel %vm2103_vm1, 1.0, %v2059_v5  ;;  %vm2111_vm2 = vcmp.ne.f32.partialorder %v67_v3, %v67_v3  ;;  %v1374_v34 = vor.u32 %v1889_v32, %v1373_v31  ;;  %v1375_v35 = vld [vmem:[#allocation2 + $0x48] sm:$0xf0]  ;;  %v1886_v37 = vld [vmem:[#allocation2 + $0x34] sm:$0xf]  ;;  %vm53_vm7 = vmpackc.low %vm2103_vm1, %vm2103_vm1  ;;  %s2061_s16 = smov 127  }
   0xa   :  { %v42_v7 = vsel %vm41_vm0, %v40_v6, -inf  ;;  %v69_v9 = vsel %vm2111_vm2, 1.0, %v2059_v5  ;;  %137 = vmatpush.bf16.msra.mxu2 %v1382_v28  ;;  %150 = vmatpush.bf16.msra.mxu3 %v1386_v30  ;;  %v1378_v36 = vor.u32 %v1888_v33, %v1375_v35  ;;  %v1417_v38 = vld [vmem:[#allocation2 + $0x38] sm:$0xf0]  ;;  %vm82_vm4 = vmpackc.low %vm2111_vm2, %vm2111_vm2  ;;  %v1415_v40 = vld [vmem:[#allocation2 + $0x30] sm:$0xf] }
   0xb   :  { %43 = vmax.xlane.f32.xlu0 %v42_v7  ;;  %v71_v10 = vsel %vm70_vm3, %v69_v9, -inf  ;;  %v1420_v39 = vor.u32 %v1886_v37, %v1417_v38  ;;  %v1887_v41 = vld [vmem:[#allocation2 + $0x34] sm:$0xf0]  ;;  %v1884_v43 = vld [vmem:[#allocation2 + $0x24] sm:$0xf]  ;;  %v83_v48 = vsel %vm82_vm4, 0, %v2099_v1 }
   0xc   :  { %v1416_v42 = vor.u32 %v1887_v41, %v1415_v40  ;;  %v1409_v44 = vld [vmem:[#allocation2 + $0x28] sm:$0xf0]  ;;  %v1407_v45 = vld [vmem:[#allocation2 + $0x20] sm:$0xf]  ;;  %v1885_v47 = vld [vmem:[#allocation2 + $0x24] sm:$0xf0]  ;;  %v84_v54 = vunpack.c.l.bf16 %v83_v48 }
   0xd   :  { %v1412_v46 = vor.u32 %v1884_v43, %v1409_v44  ;;  %v1408_v49 = vor.u32 %v1885_v47, %v1407_v45  ;;  %v1882_v50 = vld [vmem:[#allocation2 + $0x14] sm:$0xf]  ;;  %v1401_v51 = vld [vmem:[#allocation2 + $0x18] sm:$0xf0]  ;;  %v1399_v52 = vld [vmem:[#allocation2 + $0x10] sm:$0xf] }
   0xe   :  { %138 = vmatpush.bf16.msra.mxu2 %v1374_v34  ;;  %151 = vmatpush.bf16.msra.mxu3 %v1378_v36  ;;  %v1883_v53 = vld [vmem:[#allocation2 + $0x14] sm:$0xf0]  ;;  %v1404_v55 = vor.u32 %v1882_v50, %v1401_v51  ;;  %v1880_v57 = vld [vmem:[#allocation2 + $0x4] sm:$0xf]  ;;  %v1393_v58 = vld [vmem:[#allocation2 + $0x8] sm:$0xf0] }
   0xf   :  { %v1400_v56 = vor.u32 %v1883_v53, %v1399_v52  ;;  %v1391_v59 = vld [vmem:[#allocation2] sm:$0xf]  ;;  %v1881_v60 = vld [vmem:[#allocation2 + $0x4] sm:$0xf0]  ;;  %vm85_vm5 = vcmp.eq.f32.partialorder %v84_v54, inf  ;;  %v1396_v61 = vor.u32 %v1880_v57, %v1393_v58  ;;  %v54_v2 = vsel %vm53_vm7, 0, %v2094_v0 }
  0x10   :  { %v1392_v62 = vor.u32 %v1881_v60, %v1391_v59  ;;  %vm86_vm6 = vmpackc.low %vm85_vm5, %vm85_vm5  ;;  %v55_v6 = vunpack.c.l.bf16 %v54_v2  ;;  %v1485_v54 = vld [vmem:[#allocation2 + $0xd0] sm:$0xf]  ;;  %v1487_v58 = vld [vmem:[#allocation2 + $0xd8] sm:$0xf0] }
  0x11   :  { %v87_v63 = vsel %vm86_vm6, 2139062143, %v83_v48  ;;  %v1549_v60 = vld [vmem:[#allocation2 + $0x150] sm:$0xf] }
  0x12   :  { %217 = vmatpush.bf16.msrb.mxu3 %v1420_v39  ;;  %204 = vmatpush.bf16.msrb.mxu2 %v1416_v42  ;;  %v88_v3 = vunpack.c.l.bf16 %v87_v63  ;;  %vm56_vm9 = vcmp.eq.f32.partialorder %v55_v6, inf  ;;  %v1477_v6 = vld [vmem:[#allocation2 + $0xc0] sm:$0xf] }
  0x13   :  { %72 = vmax.xlane.f32.xlu0 %v71_v10  ;;  %vm57_vm11 = vmpackc.low %vm56_vm9, %vm56_vm9 }
  0x14   :  { %vm89_vm8 = vcmp.eq.f32.partialorder %v88_v3, -inf  ;;  %v58_v9 = vsel %vm57_vm11, 2139062143, %v54_v2  ;;  %v1551_v2 = vld [vmem:[#allocation2 + $0x158] sm:$0xf0]  ;;  %vm1301_vm11 = vcmask 64512  }
  0x15   :  { %vm90_vm10 = vmpackc.low %vm89_vm8, %vm89_vm8  ;;  %v59_v10 = vunpack.c.l.bf16 %v58_v9 }
  0x16   :  { %218 = vmatpush.bf16.msrb.mxu3 %v1412_v46  ;;  %205 = vmatpush.bf16.msrb.mxu2 %v1408_v49  ;;  %v91_v7 = vsel %vm90_vm10, 4286578559, %v87_v63 }
  0x17   :  { %vm60_vm13 = vcmp.eq.f32.partialorder %v59_v10, -inf }
  0x18   :  { %vm61_vm14 = vmpackc.low %vm60_vm13, %vm60_vm13 }
  0x1a   :  { %219 = vmatpush.bf16.msrb.mxu3 %v1404_v55  ;;  %206 = vmatpush.bf16.msrb.mxu2 %v1400_v56  ;;  %v1907_v55 = vld [vmem:[#allocation2 + $0xd4] sm:$0xf0]  ;;  %v1906_v56 = vld [vmem:[#allocation2 + $0xd4] sm:$0xf] }
  0x1b   :  { %v1486_v57 = vor.u32 %v1907_v55, %v1485_v54  ;;  %v1490_v59 = vor.u32 %v1906_v56, %v1487_v58  ;;  %v1445_v54 = vld [vmem:[#allocation2 + $0x80] sm:$0xf]  ;;  %v1897_v55 = vld [vmem:[#allocation2 + $0x84] sm:$0xf0]  ;;  %v1896_v56 = vld [vmem:[#allocation2 + $0x84] sm:$0xf] }
  0x1c   :  { %v1447_v58 = vld [vmem:[#allocation2 + $0x88] sm:$0xf0] }
  0x1d   :  { %538 = vmatpush.bf16.msra.mxu0 %v1486_v57  ;;  %v1446_v57 = vor.u32 %v1897_v55, %v1445_v54  ;;  %v1954_v55 = vld [vmem:[#allocation2 + $0x254] sm:$0xf] }
  0x1e   :  { %220 = vmatpush.bf16.msrb.mxu3 %v1396_v61  ;;  %207 = vmatpush.bf16.msrb.mxu2 %v1392_v62  ;;  %v1923_v61 = vld [vmem:[#allocation2 + $0x154] sm:$0xf0]  ;;  %v1922_v62 = vld [vmem:[#allocation2 + $0x154] sm:$0xf] }
  0x1f   :  { %v1550_v63 = vor.u32 %v1923_v61, %v1549_v60  ;;  %v1554_v3 = vor.u32 %v1922_v62, %v1551_v2  ;;  %v1509_v60 = vld [vmem:[#allocation2 + $0x100] sm:$0xf]  ;;  %v1913_v61 = vld [vmem:[#allocation2 + $0x104] sm:$0xf0]  ;;  %v1912_v62 = vld [vmem:[#allocation2 + $0x104] sm:$0xf] }
  0x20   :  { %v1510_v2 = vor.u32 %v1913_v61, %v1509_v60  ;;  %v1935_v60 = vld [vmem:[#allocation2 + $0x1b4] sm:$0xf0]  ;;  %v1934_v61 = vld [vmem:[#allocation2 + $0x1b4] sm:$0xf] }
  0x21   :  { %551 = vmatpush.bf16.msra.mxu1 %v1550_v63 }
  0x7e   :  { %v44_v11 = vpop.xlane.xlu0 %43 }
  0x7f   :  { %v45_v12 = vrot.slane %v44_v11, 4 }
  0x81   :  { %v46_v13 = vmax.f32 %v44_v11, %v45_v12  ;;  %v62_v12 = vsel %vm61_vm14, 4286578559, %v58_v9  ;;  %vm1336_vm14 = vcmask 72768  }
  0x83   :  { %v47_v14 = vrot.slane %v46_v13, 2 }
  0x85   :  { %v48_v15 = vmax.f32 %v46_v13, %v47_v14 }
  0x86   :  { %v73_v16 = vpop.xlane.xlu0 %72 }
  0x87   :  { %v74_v17 = vrot.slane %v73_v16, 4  ;;  %v49_v18 = vrot.slane %v48_v15, 1 }
  0x89   :  { %v75_v19 = vmax.f32 %v73_v16, %v74_v17  ;;  %v50_v20 = vmax.f32 %v48_v15, %v49_v18  ;;  %v234_v17 = vlaneseq  ;;  %v226_v18 = vld [vmem:[%s2221_s3] ss:$8 sm:$0x3] }
  0x8b   :  { %v76_v21 = vrot.slane %v75_v19, 2  ;;  %2004 = vpush %v50_v20  ;;  %v229_v20 = vperm.slane %v226_v18, 1 }
  0x8d   :  { %v77_v22 = vmax.f32 %v75_v19, %v76_v21  ;;  %v235_v19 = vand.u32 127, %v234_v17  ;;  %v1903_v17 = vld [vmem:[#allocation2 + $0xb4] sm:$0xf0] }
  0x8f   :  { %v78_v23 = vrot.slane %v77_v22, 1  ;;  %v236_v25 = vadd.s32 128, %v235_v19 }
  0x91   :  { %v79_v24 = vmax.f32 %v77_v22, %v78_v23 }
  0x93   :  { %2006 = vpush %v79_v24  ;;  %v228_v24 = vperm.slane %v226_v18, 0  ;;  %v1902_v18 = vld [vmem:[#allocation2 + $0xb4] sm:$0xf] }
  0xbc   :  { %s2005_s0 = spop %2004 }
  0xbd   :  { %p52_p1 = scmp.gt.f32.partialorder %s2005_s0, 0.0 }
  0xbf   :  { %s63_s26 = scalar_select %p52_p1, 1, 0 }
  0xc1   :  { %v64_v11 = vstv %s63_s26 }
  0xc2   :  { %vm65_vm15 = vcmp.eq.s32.totalorder %v64_v11, 1  ;;  %v1541_v11 = vld [vmem:[#allocation2 + $0x140] sm:$0xf] }
  0xc3   :  { %v66_v13 = vsel %vm65_vm15, %v62_v12, %v2094_v0  ;;  %v1921_v12 = vld [vmem:[#allocation2 + $0x144] sm:$0xf0] }
  0xc4   :  { %s2007_s1 = spop %2006 }
  0xc5   :  { %p81_p0 = scmp.gt.f32.partialorder %s2007_s1, 0.0 }
  0xc7   :  { %s92_s2 = scalar_select %p81_p0, 1, 0 }
  0xc9   :  { %v93_v8 = vstv %s92_s2 }
  0xca   :  { %vm94_vm12 = vcmp.eq.s32.totalorder %v93_v8, 1  ;;  %v1904_v8 = vld [vmem:[#allocation2 + $0xc4] sm:$0xf] }
  0xcb   :  { %v95_v4 = vsel %vm94_vm12, %v91_v7, %v2099_v1  ;;  %v1905_v7 = vld [vmem:[#allocation2 + $0xc4] sm:$0xf0] }
  0xcc   :  { %1387 = vmatmul.msk.bf16.vlgmr.msra.gmra.mxu2 %vm70_vm3, %v95_v4  ;;  %1388 = vmatmul.msk.bf16.vlgmr.msra.gmra.mxu3 %vm70_vm3, %v95_v4  ;;  %v1478_v9 = vor.u32 %v1905_v7, %v1477_v6  ;;  %v1479_v4 = vld [vmem:[#allocation2 + $0xc8] sm:$0xf0]  ;;  %v1437_v6 = vld [vmem:[#allocation2 + $0x70] sm:$0xf]  ;;  %v1895_v7 = vld [vmem:[#allocation2 + $0x74] sm:$0xf0] }
  0xcd   :  { %564 = vmatpush.bf16.msra.mxu2 %v1490_v59  ;;  %577 = vmatpush.bf16.msra.mxu3 %v1554_v3  ;;  %v1482_v10 = vor.u32 %v1904_v8, %v1479_v4  ;;  %v1450_v59 = vor.u32 %v1896_v56, %v1447_v58  ;;  %v1511_v3 = vld [vmem:[#allocation2 + $0x108] sm:$0xf0]  ;;  %v1438_v4 = vor.u32 %v1895_v7, %v1437_v6  ;;  %v1680_v56 = vld [vmem:[#allocation2 + $0x258] sm:$0xf0] }
  0xce   :  { %539 = vmatpush.bf16.msra.mxu0 %v1478_v9  ;;  %v1514_v9 = vor.u32 %v1912_v62, %v1511_v3  ;;  %v1953_v3 = vld [vmem:[#allocation2 + $0x244] sm:$0xf0] }
  0xd1   :  { %565 = vmatpush.bf16.msra.mxu2 %v1482_v10  ;;  %v1894_v10 = vld [vmem:[#allocation2 + $0x74] sm:$0xf] }
  0xdc   :  { %1421 = vmatmul.msk.bf16.vlgmr.msrb.gmra.mxu2 %vm41_vm0, %v66_v13  ;;  %1422 = vmatmul.msk.bf16.vlgmr.msrb.gmra.mxu3 %vm41_vm0, %v66_v13  ;;  %vm246_vm0 = vcmp.lt.s32.totalorder %v236_v25, 192  ;;  %v1920_v13 = vld [vmem:[#allocation2 + $0x144] sm:$0xf]  ;;  %v1535_v25 = vld [vmem:[#allocation2 + $0x138] sm:$0xf0] }
  0xdd   :  { %v2137_v32 = vsel %vm246_vm0, 1.0, %v2059_v5 }
 0x14f   :  { %v140_v14 = vpop.f32.mrf.mxu2  ;;  %v153_v1 = vpop.f32.mrf.mxu3 }
 0x157   :  { %v142_v15 = vpop.f32.mrf.mxu2  ;;  %v155_v16 = vpop.f32.mrf.mxu3 }
 0x158   :  { %v1469_v16 = vld [vmem:[#allocation2 + $0xb0] sm:$0xf] }
 0x159   :  { %v1470_v19 = vor.u32 %v1903_v17, %v1469_v16  ;;  %v1503_v17 = vld [vmem:[#allocation2 + $0xf8] sm:$0xf0] }
 0x15b   :  { %540 = vmatpush.bf16.msra.mxu0 %v1470_v19 }
 0x15f   :  { %v209_v21 = vpop.f32.mrf.mxu2  ;;  %v222_v22 = vpop.f32.mrf.mxu3 }
 0x160   :  { %v210_v23 = vadd.f32 %v209_v21, %v140_v14  ;;  %v223_v0 = vadd.f32 %v222_v22, %v153_v1  ;;  %v1542_v14 = vor.u32 %v1921_v12, %v1541_v11  ;;  %v1543_v1 = vld [vmem:[#allocation2 + $0x148] sm:$0xf0]  ;;  %v1533_v22 = vld [vmem:[#allocation2 + $0x130] sm:$0xf]  ;;  %v1439_v11 = vld [vmem:[#allocation2 + $0x78] sm:$0xf0] }
 0x161   :  { %v1546_v15 = vor.u32 %v1920_v13, %v1543_v1  ;;  %v1442_v12 = vor.u32 %v1894_v10, %v1439_v11  ;;  %v1501_v13 = vld [vmem:[#allocation2 + $0xf0] sm:$0xf]  ;;  %v1910_v1 = vld [vmem:[#allocation2 + $0xf4] sm:$0xf] }
 0x162   :  { %v233_v26 = vadd.f32 %v229_v20, %v223_v0  ;;  %v232_v27 = vadd.f32 %v228_v24, %v210_v23  ;;  %552 = vmatpush.bf16.msra.mxu1 %v1542_v14  ;;  %v1471_v20 = vld [vmem:[#allocation2 + $0xb8] sm:$0xf0]  ;;  %v1919_v23 = vld [vmem:[#allocation2 + $0x134] sm:$0xf0]  ;;  %v1918_v24 = vld [vmem:[#allocation2 + $0x134] sm:$0xf]  ;;  %v1506_v19 = vor.u32 %v1910_v1, %v1503_v17 }
 0x163   :  { %578 = vmatpush.bf16.msra.mxu3 %v1546_v15  ;;  %v1474_v21 = vor.u32 %v1902_v18, %v1471_v20  ;;  %v1534_v0 = vor.u32 %v1919_v23, %v1533_v22  ;;  %v1911_v14 = vld [vmem:[#allocation2 + $0xf4] sm:$0xf0]  ;;  %v1429_v18 = vld [vmem:[#allocation2 + $0x60] sm:$0xf]  ;;  %v1893_v20 = vld [vmem:[#allocation2 + $0x64] sm:$0xf0] }
 0x164   :  { %v254_v28 = vmul.f32 0.0, %v233_v26  ;;  %v261_v33 = vmul.f32 0.0, %v232_v27  ;;  %v262_v34 = vmul.f32 %v2137_v32, %v233_v26  ;;  %v1502_v16 = vor.u32 %v1911_v14, %v1501_v13  ;;  %v1431_v22 = vld [vmem:[#allocation2 + $0x68] sm:$0xf0]  ;;  %v1933_v13 = vld [vmem:[#allocation2 + $0x1a4] sm:$0xf0] }
 0x165   :  { %566 = vmatpush.bf16.msra.mxu2 %v1474_v21  ;;  %v1892_v21 = vld [vmem:[#allocation2 + $0x64] sm:$0xf]  ;;  %v1430_v23 = vor.u32 %v1893_v20, %v1429_v18  ;;  %v1592_v17 = vld [vmem:[#allocation2 + $0x1a8] sm:$0xf0]  ;;  %v1662_v18 = vld [vmem:[#allocation2 + $0x230] sm:$0xf] }
 0x166   :  { %v255_v29 = vadd.f32 %v254_v28, %v232_v27  ;;  %v263_v35 = vadd.f32 %v262_v34, %v261_v33  ;;  %v1901_v28 = vld [vmem:[#allocation2 + $0xa4] sm:$0xf0]  ;;  %553 = vmatpush.bf16.msra.mxu1 %v1534_v0  ;;  %v1525_v34 = vld [vmem:[#allocation2 + $0x120] sm:$0xf]  ;;  %v1932_v14 = vld [vmem:[#allocation2 + $0x1a4] sm:$0xf] }
 0x167   :  { %v211_v30 = vpop.f32.mrf.mxu2  ;;  %v224_v31 = vpop.f32.mrf.mxu3  ;;  %v1493_v0 = vld [vmem:[#allocation2 + $0xe0] sm:$0xf] }
 0x168   :  { %256 = vadd.xlane.f32.xlu1 %v255_v29  ;;  %v1900_v29 = vld [vmem:[#allocation2 + $0xa4] sm:$0xf]  ;;  %v1463_v31 = vld [vmem:[#allocation2 + $0xa8] sm:$0xf0] }
 0x169   :  { %v1466_v33 = vor.u32 %v1900_v29, %v1463_v31 }
 0x16b   :  { %567 = vmatpush.bf16.msra.mxu2 %v1466_v33 }
 0x170   :  { %264 = vadd.xlane.f32.xlu1 %v263_v35  ;;  %v1917_v35 = vld [vmem:[#allocation2 + $0x124] sm:$0xf0] }
 0x1db   :  { %v257_v36 = vpop.xlane.xlu1 %256 }
 0x1dc   :  { %v258_v37 = vmul.f32 0.0078125, %v257_v36  ;;  %v1916_v36 = vld [vmem:[#allocation2 + $0x124] sm:$0xf] }
 0x1de   :  { %v260_v40 = vmul.f32 0.0, %v258_v37 }
 0x1e3   :  { %v265_v38 = vpop.xlane.xlu1 %264 }
 0x1e4   :  { %v266_v39 = vmul.f32 0.015625, %v265_v38  ;;  %v1527_v38 = vld [vmem:[#allocation2 + $0x128] sm:$0xf0] }
 0x1e6   :  { %v267_v41 = vmul.f32 0.0, %v266_v39  ;;  %v268_v42 = vmul.f32 %v2137_v32, %v266_v39  ;;  %v1530_v39 = vor.u32 %v1916_v36, %v1527_v38  ;;  %v1614_v36 = vld [vmem:[#allocation2 + $0x1d0] sm:$0xf] }
 0x1e8   :  { %v269_v43 = vadd.f32 %v267_v41, %v258_v37  ;;  %v270_v44 = vadd.f32 %v268_v42, %v260_v40  ;;  %v1526_v37 = vor.u32 %v1917_v35, %v1525_v34  ;;  %v1453_v40 = vld [vmem:[#allocation2 + $0x90] sm:$0xf]  ;;  %v1899_v41 = vld [vmem:[#allocation2 + $0x94] sm:$0xf0]  ;;  %v1898_v42 = vld [vmem:[#allocation2 + $0x94] sm:$0xf] }
 0x1ea   :  { %v2141_v45 = vsub.f32 %v232_v27, %v269_v43  ;;  %v2143_v46 = vsub.f32 %v233_v26, %v270_v44  ;;  %v1538_v26 = vor.u32 %v1918_v24, %v1535_v25  ;;  %v1461_v27 = vld [vmem:[#allocation2 + $0xa0] sm:$0xf]  ;;  %554 = vmatpush.bf16.msra.mxu1 %v1526_v37  ;;  %v1454_v43 = vor.u32 %v1899_v41, %v1453_v40  ;;  %v1455_v44 = vld [vmem:[#allocation2 + $0x98] sm:$0xf0]  ;;  %v1909_v25 = vld [vmem:[#allocation2 + $0xe4] sm:$0xf0] }
 0x1eb   :  { %v1462_v30 = vor.u32 %v1901_v28, %v1461_v27  ;;  %v1434_v24 = vor.u32 %v1892_v21, %v1431_v22  ;;  %v1494_v27 = vor.u32 %v1909_v25, %v1493_v0  ;;  %v1495_v28 = vld [vmem:[#allocation2 + $0xe8] sm:$0xf0]  ;;  %v1939_v37 = vld [vmem:[#allocation2 + $0x1d4] sm:$0xf0]  ;;  %v1938_v40 = vld [vmem:[#allocation2 + $0x1d4] sm:$0xf] }
 0x1ec   :  { %v273_v47 = vmul.f32 %v2141_v45, %v2141_v45  ;;  %v274_v48 = vmul.f32 %v2143_v46, %v2143_v46  ;;  %579 = vmatpush.bf16.msra.mxu3 %v1538_v26  ;;  %v1908_v26 = vld [vmem:[#allocation2 + $0xe4] sm:$0xf]  ;;  %v1616_v41 = vld [vmem:[#allocation2 + $0x1d8] sm:$0xf0]  ;;  %v1950_v21 = vld [vmem:[#allocation2 + $0x234] sm:$0xf] }
 0x1ed   :  { %541 = vmatpush.bf16.msra.mxu0 %v1462_v30  ;;  %v1498_v29 = vor.u32 %v1908_v26, %v1495_v28  ;;  %v1664_v22 = vld [vmem:[#allocation2 + $0x238] sm:$0xf0]  ;;  %v1582_v25 = vld [vmem:[#allocation2 + $0x190] sm:$0xf]  ;;  %v1931_v26 = vld [vmem:[#allocation2 + $0x194] sm:$0xf0] }
 0x1ee   :  { %v294_v49 = vmul.f32 0.0, %v273_v47  ;;  %v295_v50 = vmul.f32 %v2137_v32, %v274_v48  ;;  %v276_v52 = vmul.f32 0.0, %v274_v48  ;;  %v1517_v48 = vld [vmem:[#allocation2 + $0x110] sm:$0xf]  ;;  %v1667_v0 = vor.u32 %v1950_v21, %v1664_v22  ;;  %v1930_v28 = vld [vmem:[#allocation2 + $0x194] sm:$0xf] }
 0x1ef   :  { %v1944_v21 = vld [vmem:[#allocation2 + $0x204] sm:$0xf] }
 0x1f0   :  { %v296_v51 = vadd.f32 %v295_v50, %v294_v49  ;;  %v277_v53 = vadd.f32 %v276_v52, %v273_v47  ;;  %580 = vmatpush.bf16.msra.mxu3 %v1530_v39  ;;  %v1458_v47 = vor.u32 %v1898_v42, %v1455_v44  ;;  %v1915_v49 = vld [vmem:[#allocation2 + $0x114] sm:$0xf0]  ;;  %v1914_v50 = vld [vmem:[#allocation2 + $0x114] sm:$0xf]  ;;  %v1519_v52 = vld [vmem:[#allocation2 + $0x118] sm:$0xf0]  ;;  %v1615_v39 = vor.u32 %v1939_v37, %v1614_v36 }
 0x1f1   :  { %542 = vmatpush.bf16.msra.mxu0 %v1454_v43  ;;  %v1606_v42 = vld [vmem:[#allocation2 + $0x1c0] sm:$0xf]  ;;  %v1619_v43 = vor.u32 %v1938_v40, %v1616_v41  ;;  %v1937_v44 = vld [vmem:[#allocation2 + $0x1c4] sm:$0xf0]  ;;  %v1948_v36 = vld [vmem:[#allocation2 + $0x224] sm:$0xf]  ;;  %v1583_v41 = vor.u32 %v1931_v26, %v1582_v25 }
 0x1f2   :  { %297 = vadd.xlane.f32.xlu2 %v296_v51  ;;  %v1518_v51 = vor.u32 %v1915_v49, %v1517_v48  ;;  %568 = vmatpush.bf16.msra.mxu2 %v1458_v47  ;;  %v1936_v47 = vld [vmem:[#allocation2 + $0x1c4] sm:$0xf]  ;;  %v1608_v48 = vld [vmem:[#allocation2 + $0x1c8] sm:$0xf0]  ;;  %v1925_v25 = vld [vmem:[#allocation2 + $0x164] sm:$0xf0] }
 0x1f3   :  { %v1424_v40 = vld [vmem:[%s2221_s3 + $0x1] ss:$8 sm:$0x3]  ;;  %v1924_v26 = vld [vmem:[#allocation2 + $0x164] sm:$0xf] }
 0x1f4   :  { %555 = vmatpush.bf16.msra.mxu1 %v1518_v51  ;;  %v1678_v51 = vld [vmem:[#allocation2 + $0x250] sm:$0xf] }
 0x1f5   :  { %543 = vmatpush.bf16.msra.mxu0 %v1446_v57  ;;  %v1598_v57 = vld [vmem:[#allocation2 + $0x1b0] sm:$0xf] }
 0x1f6   :  { %569 = vmatpush.bf16.msra.mxu2 %v1450_v59  ;;  %v1683_v59 = vor.u32 %v1954_v55, %v1680_v56  ;;  %v1599_v7 = vor.u32 %v1935_v60, %v1598_v57  ;;  %v321_v55 = vperm.slane %v1424_v40, 1 }
 0x1f8   :  { %556 = vmatpush.bf16.msra.mxu1 %v1510_v2  ;;  %v1670_v2 = vld [vmem:[#allocation2 + $0x240] sm:$0xf] }
 0x1f9   :  { %544 = vmatpush.bf16.msra.mxu0 %v1438_v4  ;;  %v1671_v10 = vor.u32 %v1953_v3, %v1670_v2 }
 0x1fa   :  { %278 = vadd.xlane.f32.xlu2 %v277_v53  ;;  %v1522_v53 = vor.u32 %v1914_v50, %v1519_v52  ;;  %570 = vmatpush.bf16.msra.mxu2 %v1442_v12  ;;  %v1607_v50 = vor.u32 %v1937_v44, %v1606_v42  ;;  %v1955_v52 = vld [vmem:[#allocation2 + $0x254] sm:$0xf0]  ;;  %v1590_v12 = vld [vmem:[#allocation2 + $0x1a0] sm:$0xf] }
 0x1fb   :  { %v1679_v54 = vor.u32 %v1955_v52, %v1678_v51 }
 0x1fc   :  { %581 = vmatpush.bf16.msra.mxu3 %v1522_v53  ;;  %557 = vmatpush.bf16.msra.mxu1 %v1502_v16  ;;  %v1611_v53 = vor.u32 %v1936_v47, %v1608_v48  ;;  %v1574_v47 = vld [vmem:[#allocation2 + $0x180] sm:$0xf] }
 0x1fd   :  { %545 = vmatpush.bf16.msra.mxu0 %v1430_v23 }
 0x1fe   :  { %571 = vmatpush.bf16.msra.mxu2 %v1434_v24  ;;  %v1591_v24 = vor.u32 %v1933_v13, %v1590_v12  ;;  %v1648_v12 = vld [vmem:[#allocation2 + $0x218] sm:$0xf0]  ;;  %v1566_v13 = vld [vmem:[#allocation2 + $0x170] sm:$0xf] }
 0x200   :  { %582 = vmatpush.bf16.msra.mxu3 %v1514_v9  ;;  %558 = vmatpush.bf16.msra.mxu1 %v1494_v27  ;;  %v1672_v9 = vld [vmem:[#allocation2 + $0x248] sm:$0xf0]  ;;  %v1595_v27 = vor.u32 %v1932_v14, %v1592_v17  ;;  %v1927_v14 = vld [vmem:[#allocation2 + $0x174] sm:$0xf0]  ;;  %v1568_v17 = vld [vmem:[#allocation2 + $0x178] sm:$0xf0] }
 0x201   :  { %793 = vmatpush.bf16.msrb.mxu0 %v1615_v39 }
 0x202   :  { %819 = vmatpush.bf16.msrb.mxu2 %v1619_v43 }
 0x204   :  { %583 = vmatpush.bf16.msra.mxu3 %v1506_v19  ;;  %806 = vmatpush.bf16.msrb.mxu1 %v1679_v54  ;;  %v1951_v19 = vld [vmem:[#allocation2 + $0x234] sm:$0xf0]  ;;  %v320_v54 = vperm.slane %v1424_v40, 0  ;;  %v1940_v40 = vld [vmem:[#allocation2 + $0x1e4] sm:$0xf] }
 0x205   :  { %794 = vmatpush.bf16.msrb.mxu0 %v1607_v50  ;;  %v1663_v20 = vor.u32 %v1951_v19, %v1662_v18  ;;  %v1576_v50 = vld [vmem:[#allocation2 + $0x188] sm:$0xf0]  ;;  %v1638_v19 = vld [vmem:[#allocation2 + $0x200] sm:$0xf] }
 0x206   :  { %820 = vmatpush.bf16.msrb.mxu2 %v1611_v53 }
 0x208   :  { %584 = vmatpush.bf16.msra.mxu3 %v1498_v29  ;;  %807 = vmatpush.bf16.msrb.mxu1 %v1671_v10  ;;  %v1584_v29 = vld [vmem:[#allocation2 + $0x198] sm:$0xf0]  ;;  %v1946_v10 = vld [vmem:[#allocation2 + $0x214] sm:$0xf] }
 0x209   :  { %795 = vmatpush.bf16.msrb.mxu0 %v1599_v7  ;;  %v1587_v44 = vor.u32 %v1930_v28, %v1584_v29  ;;  %v1560_v28 = vld [vmem:[#allocation2 + $0x168] sm:$0xf0] }
 0x20a   :  { %v1563_v29 = vor.u32 %v1924_v26, %v1560_v28  ;;  %v1711_v26 = vld [vmem:[#allocation2 + $0x290] sm:$0xf] }
 0x20c   :  { %832 = vmatpush.bf16.msrb.mxu3 %v1683_v59  ;;  %808 = vmatpush.bf16.msrb.mxu1 %v1663_v20  ;;  %v1945_v20 = vld [vmem:[#allocation2 + $0x204] sm:$0xf0] }
 0x20d   :  { %796 = vmatpush.bf16.msrb.mxu0 %v1591_v24  ;;  %v1639_v22 = vor.u32 %v1945_v20, %v1638_v19 }
 0x211   :  { %797 = vmatpush.bf16.msrb.mxu0 %v1583_v41  ;;  %v1624_v41 = vld [vmem:[#allocation2 + $0x1e8] sm:$0xf0] }
 0x265   :  { %v298_v63 = vpop.xlane.xlu2 %297 }
 0x266   :  { %v299_v8 = vmul.f32 0.015625, %v298_v63  ;;  %v1600_v63 = vld [vmem:[#allocation2 + $0x1b8] sm:$0xf0] }
 0x267   :  { %v1603_v4 = vor.u32 %v1934_v61, %v1600_v63 }
 0x268   :  { %v2150_v15 = vadd.f32 1e-05, %v299_v8  ;;  %v1952_v8 = vld [vmem:[#allocation2 + $0x244] sm:$0xf] }
 0x269   :  { %v1675_v11 = vor.u32 %v1952_v8, %v1672_v9  ;;  %821 = vmatpush.bf16.msrb.mxu2 %v1603_v4  ;;  %v1947_v4 = vld [vmem:[#allocation2 + $0x214] sm:$0xf0] }
 0x26a   :  { %2020 = vrsqrt.f32 %v2150_v15  ;;  %vm307_vm2 = vweird.f32 %v2150_v15 }
 0x26b   :  { %833 = vmatpush.bf16.msrb.mxu3 %v1675_v11 }
 0x26d   :  { %v279_v30 = vpop.xlane.xlu2 %278  ;;  %822 = vmatpush.bf16.msrb.mxu2 %v1595_v27 }
 0x26e   :  { %v280_v31 = vmul.f32 0.0078125, %v279_v30  ;;  %v1654_v30 = vld [vmem:[#allocation2 + $0x220] sm:$0xf] }
 0x26f   :  { %834 = vmatpush.bf16.msrb.mxu3 %v1667_v0  ;;  %v1558_v0 = vld [vmem:[#allocation2 + $0x160] sm:$0xf] }
 0x270   :  { %v2153_v33 = vpop.eup %2020  ;;  %v2155_v34 = vadd.f32 1e-05, %v280_v31  ;;  %v1559_v27 = vor.u32 %v1925_v25, %v1558_v0  ;;  %v1785_v0 = vld [vmem:[#allocation2 + $0x328] sm:$0xf0] }
 0x271   :  { %v302_v35 = vmul.f32 %v2153_v33, %v2150_v15  ;;  %vm308_vm1 = vweird.f32 %v2153_v33  ;;  %823 = vmatpush.bf16.msrb.mxu2 %v1587_v44  ;;  %v1971_v44 = vld [vmem:[#allocation2 + $0x2d4] sm:$0xf0] }
 0x272   :  { %2022 = vrsqrt.f32 %v2155_v34  ;;  %vm309_vm3 = vmor %vm307_vm2, %vm308_vm1  ;;  %vm288_vm5 = vweird.f32 %v2155_v34 }
 0x273   :  { %v303_v38 = vmul.f32 %v2153_v33, %v302_v35  ;;  %v1949_v35 = vld [vmem:[#allocation2 + $0x224] sm:$0xf0] }
 0x274   :  { %v1655_v37 = vor.u32 %v1949_v35, %v1654_v30  ;;  %v1630_v30 = vld [vmem:[#allocation2 + $0x1f0] sm:$0xf]  ;;  %v1942_v35 = vld [vmem:[#allocation2 + $0x1f4] sm:$0xf] }
 0x275   :  { %v304_v49 = vmul.f32 0.5, %v303_v38  ;;  %v1656_v38 = vld [vmem:[#allocation2 + $0x228] sm:$0xf0] }
 0x276   :  { %v1659_v42 = vor.u32 %v1948_v36, %v1656_v38  ;;  %809 = vmatpush.bf16.msrb.mxu1 %v1655_v37  ;;  %v1632_v36 = vld [vmem:[#allocation2 + $0x1f8] sm:$0xf0]  ;;  %v1622_v38 = vld [vmem:[#allocation2 + $0x1e0] sm:$0xf] }
 0x277   :  { %v305_v58 = vsub.f32 1.5, %v304_v49  ;;  %v1928_v49 = vld [vmem:[#allocation2 + $0x184] sm:$0xf]  ;;  %v1635_v37 = vor.u32 %v1942_v35, %v1632_v36 }
 0x278   :  { %v2161_v62 = vpop.eup %2022  ;;  %835 = vmatpush.bf16.msrb.mxu3 %v1659_v42  ;;  %v1579_v60 = vor.u32 %v1928_v49, %v1576_v50  ;;  %v1627_v42 = vor.u32 %v1940_v40, %v1624_v41  ;;  %v1735_v49 = vld [vmem:[#allocation2 + $0x2c0] sm:$0xf]  ;;  %v1969_v50 = vld [vmem:[#allocation2 + $0x2c4] sm:$0xf0] }
 0x279   :  { %v283_v6 = vmul.f32 %v2161_v62, %v2155_v34  ;;  %v306_v1 = vmul.f32 %v2153_v33, %v305_v58  ;;  %vm289_vm4 = vweird.f32 %v2161_v62  ;;  %v1929_v34 = vld [vmem:[#allocation2 + $0x184] sm:$0xf0] }
 0x27a   :  { %vm290_vm6 = vmor %vm288_vm5, %vm289_vm4  ;;  %v1575_v56 = vor.u32 %v1929_v34, %v1574_v47  ;;  %824 = vmatpush.bf16.msrb.mxu2 %v1579_v60  ;;  %v1970_v47 = vld [vmem:[#allocation2 + $0x2d4] sm:$0xf]  ;;  %vm1363_vm4 = vcmask 138240  }
 0x27b   :  { %v284_v16 = vmul.f32 %v2161_v62, %v283_v6  ;;  %v310_v15 = vsel %vm309_vm3, %v2153_v33, %v306_v1  ;;  %v1425_v33 = vld [vmem:[%s2221_s3 + $0x2] ss:$8 sm:$0x3]  ;;  %v1926_v1 = vld [vmem:[#allocation2 + $0x174] sm:$0xf]  ;;  %vm1361_vm3 = vcmask 130048  }
 0x27c   :  { %v311_v43 = vmul.f32 0.0, %v310_v15  ;;  %v312_v51 = vmul.f32 %v2137_v32, %v310_v15  ;;  %v329_v58 = vperm.slane %v1425_v33, 0  ;;  %v330_v63 = vperm.slane %v1425_v33, 1  ;;  %798 = vmatpush.bf16.msrb.mxu0 %v1575_v56  ;;  %v1943_v15 = vld [vmem:[#allocation2 + $0x1f4] sm:$0xf0] }
 0x27d   :  { %v285_v23 = vmul.f32 0.5, %v284_v16  ;;  %v1567_v16 = vor.u32 %v1927_v14, %v1566_v13  ;;  %v1571_v18 = vor.u32 %v1926_v1, %v1568_v17  ;;  %v1987_v56 = vld [vmem:[#allocation2 + $0x354] sm:$0xf0]  ;;  %v1982_v14 = vld [vmem:[#allocation2 + $0x334] sm:$0xf] }
 0x27e   :  { %v1983_v13 = vld [vmem:[#allocation2 + $0x334] sm:$0xf0]  ;;  %v1964_v1 = vld [vmem:[#allocation2 + $0x2a4] sm:$0xf]  ;;  %v1793_v17 = vld [vmem:[#allocation2 + $0x338] sm:$0xf0] }
 0x27f   :  { %v286_v31 = vsub.f32 1.5, %v285_v23  ;;  %v1640_v23 = vld [vmem:[#allocation2 + $0x208] sm:$0xf0]  ;;  %825 = vmatpush.bf16.msrb.mxu2 %v1571_v18  ;;  %v1426_v18 = vld [vmem:[%s2221_s3 + $0x3] ss:$8 sm:$0x3]  ;;  %v1796_v20 = vor.u32 %v1982_v14, %v1793_v17 }
 0x280   :  { %799 = vmatpush.bf16.msrb.mxu0 %v1567_v16  ;;  %v1643_v24 = vor.u32 %v1944_v21, %v1640_v23  ;;  %v1721_v16 = vld [vmem:[#allocation2 + $0x2a8] sm:$0xf0]  ;;  %v1783_v21 = vld [vmem:[#allocation2 + $0x320] sm:$0xf]  ;;  %v1981_v23 = vld [vmem:[#allocation2 + $0x324] sm:$0xf0] }
 0x281   :  { %v287_v39 = vmul.f32 %v2161_v62, %v286_v31  ;;  %v1631_v31 = vor.u32 %v1943_v15, %v1630_v30  ;;  %v1724_v25 = vor.u32 %v1964_v1, %v1721_v16  ;;  %v374_v28 = vperm.slane %v1426_v18, 0  ;;  %v1713_v30 = vld [vmem:[#allocation2 + $0x298] sm:$0xf0]  ;;  %v1687_v14 = vld [vmem:[#allocation2 + $0x260] sm:$0xf] }
 0x282   :  { %v1784_v15 = vor.u32 %v1981_v23, %v1783_v21  ;;  %v1957_v1 = vld [vmem:[#allocation2 + $0x264] sm:$0xf0]  ;;  %v1956_v17 = vld [vmem:[#allocation2 + $0x264] sm:$0xf]  ;;  %v1975_v21 = vld [vmem:[#allocation2 + $0x2f4] sm:$0xf0] }
 0x283   :  { %v291_v48 = vsel %vm290_vm6, %v2161_v62, %v287_v39  ;;  %826 = vmatpush.bf16.msrb.mxu2 %v1563_v29  ;;  %v1941_v39 = vld [vmem:[#allocation2 + $0x1e4] sm:$0xf0]  ;;  %v1962_v29 = vld [vmem:[#allocation2 + $0x294] sm:$0xf]  ;;  %v1688_v16 = vor.u32 %v1957_v1, %v1687_v14 }
 0x284   :  { %v293_v52 = vmul.f32 0.0, %v291_v48  ;;  %v313_v53 = vadd.f32 %v311_v43, %v291_v48  ;;  %800 = vmatpush.bf16.msrb.mxu0 %v1559_v27  ;;  %v1623_v33 = vor.u32 %v1941_v39, %v1622_v38  ;;  %v1743_v43 = vld [vmem:[#allocation2 + $0x2d0] sm:$0xf]  ;;  %v1745_v48 = vld [vmem:[#allocation2 + $0x2d8] sm:$0xf0] }
 0x285   :  { %v1744_v34 = vor.u32 %v1971_v44, %v1743_v43  ;;  %v1963_v27 = vld [vmem:[#allocation2 + $0x294] sm:$0xf0]  ;;  %v1990_v14 = vld [vmem:[#allocation2 + $0x384] sm:$0xf0] }
 0x286   :  { %v315_v57 = vmul.f32 %v313_v53, %v2141_v45  ;;  %v314_v59 = vadd.f32 %v312_v51, %v293_v52  ;;  %v1646_v45 = vld [vmem:[#allocation2 + $0x210] sm:$0xf]  ;;  %v1748_v51 = vor.u32 %v1970_v47, %v1745_v48  ;;  %v1968_v52 = vld [vmem:[#allocation2 + $0x2c4] sm:$0xf]  ;;  %v1737_v53 = vld [vmem:[#allocation2 + $0x2c8] sm:$0xf0]  ;;  %v1712_v35 = vor.u32 %v1963_v27, %v1711_v26 }
 0x287   :  { %v1647_v11 = vor.u32 %v1947_v4, %v1646_v45  ;;  %v1973_v26 = vld [vmem:[#allocation2 + $0x2e4] sm:$0xf0]  ;;  %v1972_v27 = vld [vmem:[#allocation2 + $0x2e4] sm:$0xf] }
 0x288   :  { %v324_v61 = vmul.f32 %v320_v54, %v315_v57  ;;  %v316_v62 = vmul.f32 %v314_v59, %v2143_v46  ;;  %v1651_v46 = vor.u32 %v1946_v10, %v1648_v12  ;;  %v1807_v54 = vld [vmem:[#allocation2 + $0x350] sm:$0xf]  ;;  %v1986_v57 = vld [vmem:[#allocation2 + $0x354] sm:$0xf]  ;;  %v1740_v59 = vor.u32 %v1968_v52, %v1737_v53  ;;  %v1719_v10 = vld [vmem:[#allocation2 + $0x2a0] sm:$0xf] }
 0x289   :  { %810 = vmatpush.bf16.msrb.mxu1 %v1647_v11  ;;  %v1808_v60 = vor.u32 %v1987_v56, %v1807_v54  ;;  %v1965_v11 = vld [vmem:[#allocation2 + $0x2a4] sm:$0xf0]  ;;  %v1703_v54 = vld [vmem:[#allocation2 + $0x280] sm:$0xf]  ;;  %v1960_v56 = vld [vmem:[#allocation2 + $0x284] sm:$0xf] }
 0x28a   :  { %v333_v32 = vadd.f32 %v329_v58, %v324_v61  ;;  %v325_v2 = vmul.f32 %v321_v55, %v316_v62  ;;  %836 = vmatpush.bf16.msrb.mxu3 %v1651_v46  ;;  %v1736_v55 = vor.u32 %v1969_v50, %v1735_v49  ;;  %v1809_v58 = vld [vmem:[#allocation2 + $0x358] sm:$0xf0]  ;;  %v1727_v62 = vld [vmem:[#allocation2 + $0x2b0] sm:$0xf] }
 0x28b   :  { %v1812_v61 = vor.u32 %v1986_v57, %v1809_v58  ;;  %v1791_v46 = vld [vmem:[#allocation2 + $0x330] sm:$0xf]  ;;  %v1705_v58 = vld [vmem:[#allocation2 + $0x288] sm:$0xf0] }
 0x28c   :  { %v335_v3 = vmax.f32 %v333_v32, 0.0  ;;  %v334_v6 = vadd.f32 %v330_v63, %v325_v2  ;;  %v1967_v63 = vld [vmem:[#allocation2 + $0x2b4] sm:$0xf0]  ;;  %v1966_v32 = vld [vmem:[#allocation2 + $0x2b4] sm:$0xf]  ;;  %v1792_v19 = vor.u32 %v1983_v13, %v1791_v46 }
 0x28d   :  { %811 = vmatpush.bf16.msrb.mxu1 %v1639_v22  ;;  %v1729_v2 = vld [vmem:[#allocation2 + $0x2b8] sm:$0xf0]  ;;  %v1728_v45 = vor.u32 %v1967_v63, %v1727_v62  ;;  %v1720_v22 = vor.u32 %v1965_v11, %v1719_v10  ;;  %v1978_v62 = vld [vmem:[#allocation2 + $0x314] sm:$0xf]  ;;  %v1977_v10 = vld [vmem:[#allocation2 + $0x304] sm:$0xf0] }
 0x28e   :  { %v337_v7 = vpack.c.bf16 %v335_v3, %v335_v3  ;;  %v336_v8 = vmax.f32 %v334_v6, 0.0  ;;  %837 = vmatpush.bf16.msrb.mxu3 %v1643_v24  ;;  %v1799_v3 = vld [vmem:[#allocation2 + $0x340] sm:$0xf]  ;;  %v1985_v6 = vld [vmem:[#allocation2 + $0x344] sm:$0xf0]  ;;  %v1732_v12 = vor.u32 %v1966_v32, %v1729_v2 }
 0x28f   :  { %v1980_v24 = vld [vmem:[#allocation2 + $0x324] sm:$0xf]  ;;  %v1777_v32 = vld [vmem:[#allocation2 + $0x318] sm:$0xf0]  ;;  %v1769_v46 = vld [vmem:[#allocation2 + $0x308] sm:$0xf0] }
 0x290   :  { %546 = vmatmul.bf16.vlgmr.msra.gmra.mxu0 %v337_v7  ;;  %572 = vmatmul.bf16.vlgmr.msra.gmra.mxu2 %v337_v7  ;;  %v338_v9 = vpack.c.bf16 %v336_v8, %v336_v8  ;;  %v1800_v7 = vor.u32 %v1985_v6, %v1799_v3  ;;  %v1984_v8 = vld [vmem:[#allocation2 + $0x344] sm:$0xf]  ;;  %v1780_v2 = vor.u32 %v1978_v62, %v1777_v32  ;;  %v1695_v3 = vld [vmem:[#allocation2 + $0x270] sm:$0xf]  ;;  %v1959_v6 = vld [vmem:[#allocation2 + $0x274] sm:$0xf0] }
 0x291   :  { %812 = vmatpush.bf16.msrb.mxu1 %v1631_v31  ;;  %1046 = vmatpush.bf16.msra.mxu0 %v1744_v34  ;;  %v1788_v31 = vor.u32 %v1980_v24, %v1785_v0  ;;  %v1976_v11 = vld [vmem:[#allocation2 + $0x304] sm:$0xf]  ;;  %v1761_v24 = vld [vmem:[#allocation2 + $0x2f8] sm:$0xf0] }
 0x292   :  { %559 = vmatmul.bf16.vlgmr.msra.gmra.mxu1 %v338_v9  ;;  %585 = vmatmul.bf16.vlgmr.msra.gmra.mxu3 %v338_v9  ;;  %v1801_v9 = vld [vmem:[#allocation2 + $0x348] sm:$0xf0]  ;;  %v1772_v13 = vor.u32 %v1976_v11, %v1769_v46  ;;  %v1864_v11 = vld [vmem:[#allocation2 + $0x420] sm:$0xf] }
 0x293   :  { %838 = vmatpush.bf16.msrb.mxu3 %v1635_v37  ;;  %1072 = vmatpush.bf16.msra.mxu2 %v1748_v51  ;;  %v1804_v4 = vor.u32 %v1984_v8, %v1801_v9  ;;  %v1716_v37 = vor.u32 %v1962_v29, %v1713_v30  ;;  %v1696_v8 = vor.u32 %v1959_v6, %v1695_v3  ;;  %v1697_v9 = vld [vmem:[#allocation2 + $0x278] sm:$0xf0]  ;;  %v1753_v29 = vld [vmem:[#allocation2 + $0x2e8] sm:$0xf0] }
 0x294   :  { %v1756_v30 = vor.u32 %v1972_v27, %v1753_v29  ;;  %v1852_v27 = vld [vmem:[#allocation2 + $0x3f0] sm:$0xf] }
 0x295   :  { %813 = vmatpush.bf16.msrb.mxu1 %v1623_v33  ;;  %1047 = vmatpush.bf16.msra.mxu0 %v1736_v55  ;;  %v375_v33 = vperm.slane %v1426_v18, 1  ;;  %v1961_v55 = vld [vmem:[#allocation2 + $0x284] sm:$0xf0]  ;;  %v1689_v18 = vld [vmem:[#allocation2 + $0x268] sm:$0xf0] }
 0x296   :  { %v1704_v57 = vor.u32 %v1961_v55, %v1703_v54 }
 0x297   :  { %839 = vmatpush.bf16.msrb.mxu3 %v1627_v42  ;;  %1073 = vmatpush.bf16.msra.mxu2 %v1740_v59  ;;  %v1708_v59 = vor.u32 %v1960_v56, %v1705_v58  ;;  %v1828_v56 = vld [vmem:[#allocation2 + $0x390] sm:$0xf] }
 0x299   :  { %1059 = vmatpush.bf16.msra.mxu1 %v1808_v60  ;;  %1048 = vmatpush.bf16.msra.mxu0 %v1728_v45  ;;  %v1775_v60 = vld [vmem:[#allocation2 + $0x310] sm:$0xf] }
 0x29b   :  { %1085 = vmatpush.bf16.msra.mxu3 %v1812_v61  ;;  %1074 = vmatpush.bf16.msra.mxu2 %v1732_v12  ;;  %v1979_v61 = vld [vmem:[#allocation2 + $0x314] sm:$0xf0] }
 0x29c   :  { %v1776_v63 = vor.u32 %v1979_v61, %v1775_v60 }
 0x29d   :  { %1060 = vmatpush.bf16.msra.mxu1 %v1800_v7  ;;  %1049 = vmatpush.bf16.msra.mxu0 %v1720_v22  ;;  %v1958_v7 = vld [vmem:[#allocation2 + $0x274] sm:$0xf] }
 0x29e   :  { %v1700_v45 = vor.u32 %v1958_v7, %v1697_v9  ;;  %v1974_v22 = vld [vmem:[#allocation2 + $0x2f4] sm:$0xf] }
 0x29f   :  { %1086 = vmatpush.bf16.msra.mxu3 %v1804_v4  ;;  %1075 = vmatpush.bf16.msra.mxu2 %v1724_v25  ;;  %v1767_v4 = vld [vmem:[#allocation2 + $0x300] sm:$0xf]  ;;  %v1764_v0 = vor.u32 %v1974_v22, %v1761_v24 }
 0x2a0   :  { %v1768_v12 = vor.u32 %v1977_v10, %v1767_v4  ;;  %v1751_v25 = vld [vmem:[#allocation2 + $0x2e0] sm:$0xf] }
 0x2a1   :  { %1061 = vmatpush.bf16.msra.mxu1 %v1792_v19  ;;  %1050 = vmatpush.bf16.msra.mxu0 %v1712_v35  ;;  %v1692_v19 = vor.u32 %v1956_v17, %v1689_v18  ;;  %v1840_v35 = vld [vmem:[#allocation2 + $0x3c0] sm:$0xf]  ;;  %v1999_v17 = vld [vmem:[#allocation2 + $0x414] sm:$0xf0] }
 0x2a2   :  { %v1856_v22 = vld [vmem:[#allocation2 + $0x400] sm:$0xf] }
 0x2a3   :  { %1087 = vmatpush.bf16.msra.mxu3 %v1796_v20  ;;  %1076 = vmatpush.bf16.msra.mxu2 %v1716_v37  ;;  %v1759_v20 = vld [vmem:[#allocation2 + $0x2f0] sm:$0xf]  ;;  %v1994_v37 = vld [vmem:[#allocation2 + $0x3c4] sm:$0xf0] }
 0x2a4   :  { %v1760_v23 = vor.u32 %v1975_v21, %v1759_v20  ;;  %v1989_v20 = vld [vmem:[#allocation2 + $0x374] sm:$0xf0] }
 0x2a5   :  { %1062 = vmatpush.bf16.msra.mxu1 %v1784_v15  ;;  %1051 = vmatpush.bf16.msra.mxu0 %v1704_v57  ;;  %v1844_v15 = vld [vmem:[#allocation2 + $0x3d0] sm:$0xf]  ;;  %v1991_v57 = vld [vmem:[#allocation2 + $0x394] sm:$0xf0] }
 0x2a7   :  { %1088 = vmatpush.bf16.msra.mxu3 %v1788_v31  ;;  %1077 = vmatpush.bf16.msra.mxu2 %v1708_v59  ;;  %v1995_v31 = vld [vmem:[#allocation2 + $0x3d4] sm:$0xf0]  ;;  %v1829_v59 = vor.u32 %v1991_v57, %v1828_v56 }
 0x2a9   :  { %1063 = vmatpush.bf16.msra.mxu1 %v1776_v63  ;;  %1052 = vmatpush.bf16.msra.mxu0 %v1696_v8 }
 0x2ab   :  { %1089 = vmatpush.bf16.msra.mxu3 %v1780_v2  ;;  %1078 = vmatpush.bf16.msra.mxu2 %v1700_v45 }
 0x2ad   :  { %1064 = vmatpush.bf16.msra.mxu1 %v1768_v12  ;;  %1053 = vmatpush.bf16.msra.mxu0 %v1688_v16  ;;  %v2000_v12 = vld [vmem:[#allocation2 + $0x424] sm:$0xf0]  ;;  %v1860_v16 = vld [vmem:[#allocation2 + $0x410] sm:$0xf] }
 0x2ae   :  { %v1865_v46 = vor.u32 %v2000_v12, %v1864_v11  ;;  %v1861_v18 = vor.u32 %v1999_v17, %v1860_v16 }
 0x2af   :  { %1090 = vmatpush.bf16.msra.mxu3 %v1772_v13  ;;  %1079 = vmatpush.bf16.msra.mxu2 %v1692_v19  ;;  %v1824_v13 = vld [vmem:[#allocation2 + $0x380] sm:$0xf]  ;;  %v1820_v19 = vld [vmem:[#allocation2 + $0x370] sm:$0xf] }
 0x2b0   :  { %v1825_v1 = vor.u32 %v1990_v14, %v1824_v13  ;;  %v1821_v21 = vor.u32 %v1989_v20, %v1820_v19  ;;  %v1878_v13 = vld [vmem:[%s2221_s3 + $0x7] ss:$8 sm:$0x3] }
 0x2b1   :  { %1065 = vmatpush.bf16.msra.mxu1 %v1760_v23  ;;  %v1998_v23 = vld [vmem:[#allocation2 + $0x404] sm:$0xf0]  ;;  %v1290_v16 = vperm.slane %v1878_v13, 0 }
 0x2b2   :  { %v1857_v24 = vor.u32 %v1998_v23, %v1856_v22 }
 0x2b3   :  { %1091 = vmatpush.bf16.msra.mxu3 %v1764_v0  ;;  %v1816_v0 = vld [vmem:[#allocation2 + $0x360] sm:$0xf] }
 0x2b7   :  { %1092 = vmatpush.bf16.msra.mxu3 %v1756_v30  ;;  %v1848_v30 = vld [vmem:[#allocation2 + $0x3e0] sm:$0xf] }
 0x30d   :  { %v547_v36 = vpop.f32.mrf.mxu0 }
 0x30e   :  { %v548_v38 = vadd.f32 %v547_v36, %v374_v28  ;;  %v1752_v28 = vor.u32 %v1973_v26, %v1751_v25  ;;  %v1845_v36 = vor.u32 %v1995_v31, %v1844_v15  ;;  %v1988_v25 = vld [vmem:[#allocation2 + $0x364] sm:$0xf0] }
 0x30f   :  { %v560_v39 = vpop.f32.mrf.mxu1  ;;  %v1817_v26 = vor.u32 %v1988_v25, %v1816_v0  ;;  %v1996_v15 = vld [vmem:[#allocation2 + $0x3e4] sm:$0xf0] }
 0x310   :  { %v561_v40 = vadd.f32 %v560_v39, %v548_v38  ;;  %1066 = vmatpush.bf16.msra.mxu1 %v1752_v28  ;;  %v1876_v38 = vld [vmem:[#allocation2 + $0x450] sm:$0xf]  ;;  %v2003_v39 = vld [vmem:[#allocation2 + $0x454] sm:$0xf0]  ;;  %v1849_v31 = vor.u32 %v1996_v15, %v1848_v30 }
 0x311   :  { %v1997_v28 = vld [vmem:[#allocation2 + $0x3f4] sm:$0xf0] }
 0x312   :  { %v590_v41 = vmax.f32 %v561_v40, 0.0  ;;  %v1877_v40 = vor.u32 %v2003_v39, %v1876_v38  ;;  %v1853_v29 = vor.u32 %v1997_v28, %v1852_v27 }
 0x313   :  { %v573_v42 = vpop.f32.mrf.mxu2 }
 0x314   :  { %v592_v43 = vpack.c.bf16 %v590_v41, %v590_v41  ;;  %v574_v44 = vadd.f32 %v573_v42, %v375_v33  ;;  %v1872_v33 = vld [vmem:[#allocation2 + $0x440] sm:$0xf]  ;;  %v1841_v41 = vor.u32 %v1994_v37, %v1840_v35  ;;  %v2002_v42 = vld [vmem:[#allocation2 + $0x444] sm:$0xf0] }
 0x315   :  { %v549_v47 = vpop.f32.mrf.mxu0  ;;  %v586_v34 = vpop.f32.mrf.mxu3  ;;  %v1684_v35 = vld [vmem:[%s2221_s3 + $0x5] ss:$8 sm:$0x3] }
 0x316   :  { %v587_v48 = vadd.f32 %v586_v34, %v574_v44  ;;  %801 = vmatmul.bf16.vlgmr.msrb.gmra.mxu0 %v592_v43  ;;  %827 = vmatmul.bf16.vlgmr.msrb.gmra.mxu2 %v592_v43  ;;  %v1836_v43 = vld [vmem:[#allocation2 + $0x3b0] sm:$0xf]  ;;  %v1993_v44 = vld [vmem:[#allocation2 + $0x3b4] sm:$0xf0]  ;;  %v1873_v47 = vor.u32 %v2002_v42, %v1872_v33  ;;  %v882_v37 = vperm.slane %v1684_v35, 0 }
 0x317   :  { %v562_v49 = vpop.f32.mrf.mxu1  ;;  %1235 = vmatpush.bf16.msrb.mxu0 %v1845_v36  ;;  %v1868_v34 = vld [vmem:[#allocation2 + $0x430] sm:$0xf] }
 0x318   :  { %v591_v50 = vmax.f32 %v587_v48, 0.0  ;;  %v2001_v48 = vld [vmem:[#allocation2 + $0x434] sm:$0xf0]  ;;  %v1837_v49 = vor.u32 %v1993_v44, %v1836_v43 }
 0x31a   :  { %v593_v51 = vpack.c.bf16 %v591_v50, %v591_v50  ;;  %v1832_v50 = vld [vmem:[#allocation2 + $0x3a0] sm:$0xf] }
 0x31b   :  { %v575_v52 = vpop.f32.mrf.mxu2  ;;  %1236 = vmatpush.bf16.msrb.mxu0 %v1841_v41  ;;  %v883_v41 = vperm.slane %v1684_v35, 1 }
 0x31c   :  { %814 = vmatmul.bf16.vlgmr.msrb.gmra.mxu1 %v593_v51  ;;  %840 = vmatmul.bf16.vlgmr.msrb.gmra.mxu3 %v593_v51  ;;  %v1992_v51 = vld [vmem:[#allocation2 + $0x3a4] sm:$0xf0]  ;;  %v1869_v52 = vor.u32 %v2001_v48, %v1868_v34 }
 0x31d   :  { %v588_v53 = vpop.f32.mrf.mxu3  ;;  %1248 = vmatpush.bf16.msrb.mxu1 %v1877_v40  ;;  %v1833_v54 = vor.u32 %v1992_v51, %v1832_v50 }
 0x31e   :  { %v1555_v53 = vld [vmem:[%s2221_s3 + $0x4] ss:$8 sm:$0x3] }
 0x31f   :  { %1237 = vmatpush.bf16.msrb.mxu0 %v1837_v49  ;;  %v629_v58 = vperm.slane %v1555_v53, 0  ;;  %v630_v32 = vperm.slane %v1555_v53, 1 }
 0x321   :  { %1249 = vmatpush.bf16.msrb.mxu1 %v1873_v47 }
 0x323   :  { %1238 = vmatpush.bf16.msrb.mxu0 %v1833_v54 }
 0x325   :  { %1250 = vmatpush.bf16.msrb.mxu1 %v1869_v52 }
 0x327   :  { %1239 = vmatpush.bf16.msrb.mxu0 %v1829_v59 }
 0x329   :  { %1251 = vmatpush.bf16.msrb.mxu1 %v1865_v46 }
 0x32b   :  { %1240 = vmatpush.bf16.msrb.mxu0 %v1825_v1 }
 0x32d   :  { %1252 = vmatpush.bf16.msrb.mxu1 %v1861_v18 }
 0x32f   :  { %1241 = vmatpush.bf16.msrb.mxu0 %v1821_v21 }
 0x331   :  { %1253 = vmatpush.bf16.msrb.mxu1 %v1857_v24 }
 0x333   :  { %1242 = vmatpush.bf16.msrb.mxu0 %v1817_v26 }
 0x335   :  { %1254 = vmatpush.bf16.msrb.mxu1 %v1853_v29 }
 0x339   :  { %1255 = vmatpush.bf16.msrb.mxu1 %v1849_v31 }
 0x393   :  { %v802_v55 = vpop.f32.mrf.mxu0 }
 0x394   :  { %v803_v60 = vadd.f32 %v802_v55, %v629_v58 }
 0x399   :  { %v815_v61 = vpop.f32.mrf.mxu1  ;;  %v828_v62 = vpop.f32.mrf.mxu2 }
 0x39a   :  { %v816_v63 = vadd.f32 %v815_v61, %v803_v60  ;;  %v829_v6 = vadd.f32 %v828_v62, %v630_v32 }
 0x39b   :  { %v804_v2 = vpop.f32.mrf.mxu0 }
 0x39c   :  { %v845_v3 = vpack.c.bf16 %v816_v63, %v816_v63 }
 0x39e   :  { %1054 = vmatmul.bf16.vlgmr.msra.gmra.mxu0 %v845_v3  ;;  %1080 = vmatmul.bf16.vlgmr.msra.gmra.mxu2 %v845_v3 }
 0x39f   :  { %v841_v7 = vpop.f32.mrf.mxu3 }
 0x3a0   :  { %v842_v8 = vadd.f32 %v841_v7, %v829_v6  ;;  %v1813_v7 = vld [vmem:[%s2221_s3 + $0x6] ss:$8 sm:$0x3] }
 0x3a1   :  { %v817_v9 = vpop.f32.mrf.mxu1  ;;  %v830_v45 = vpop.f32.mrf.mxu2 }
 0x3a2   :  { %v846_v4 = vpack.c.bf16 %v842_v8, %v842_v8  ;;  %v1137_v9 = vperm.slane %v1813_v7, 0 }
 0x3a4   :  { %1067 = vmatmul.bf16.vlgmr.msra.gmra.mxu1 %v846_v4  ;;  %1093 = vmatmul.bf16.vlgmr.msra.gmra.mxu3 %v846_v4 }
 0x3a7   :  { %v843_v10 = vpop.f32.mrf.mxu3 }
 0x41b   :  { %v1055_v36 = vpop.f32.mrf.mxu0 }
 0x41c   :  { %v1056_v38 = vadd.f32 %v1055_v36, %v882_v37 }
 0x421   :  { %v1068_v39 = vpop.f32.mrf.mxu1  ;;  %v1081_v40 = vpop.f32.mrf.mxu2 }
 0x422   :  { %v1069_v33 = vadd.f32 %v1068_v39, %v1056_v38  ;;  %v1082_v47 = vadd.f32 %v1081_v40, %v883_v41 }
 0x423   :  { %v1057_v42 = vpop.f32.mrf.mxu0 }
 0x424   :  { %v1098_v43 = vmax.f32 %v1069_v33, 0.0 }
 0x426   :  { %v1100_v44 = vpack.c.bf16 %v1098_v43, %v1098_v43 }
 0x427   :  { %v1094_v34 = vpop.f32.mrf.mxu3 }
 0x428   :  { %v1095_v48 = vadd.f32 %v1094_v34, %v1082_v47  ;;  %1243 = vmatmul.bf16.vlgmr.msrb.gmra.mxu0 %v1100_v44 }
 0x429   :  { %v1070_v49 = vpop.f32.mrf.mxu1  ;;  %v1083_v50 = vpop.f32.mrf.mxu2 }
 0x42a   :  { %v1099_v51 = vmax.f32 %v1095_v48, 0.0  ;;  %v1879_v52 = vmul.f32 -1.442695, %v1095_v48 }
 0x42c   :  { %v1101_v53 = vpack.c.bf16 %v1099_v51, %v1099_v51  ;;  %2024 = vpow2.f32 %v1879_v52 }
 0x42e   :  { %1256 = vmatmul.bf16.vlgmr.msrb.gmra.mxu1 %v1101_v53 }
 0x42f   :  { %v1096_v54 = vpop.f32.mrf.mxu3 }
 0x432   :  { %v2025_v55 = vpop.eup %2024 }
 0x433   :  { %v1272_v56 = vadd.f32 1.0, %v2025_v55 }
 0x435   :  { %2026 = vrcp.f32 %v1272_v56  ;;  %v1284_v60 = vand.u32 2147483648, %v1272_v56  ;;  %v1282_v62 = vand.u32 2147483647, %v1272_v56  ;;  %vm1278_vm8 = vweird.f32 %v1272_v56 }
 0x437   :  { %v1285_v32 = vor.u32 1.1754944e-38, %v1284_v60  ;;  %vm1283_vm10 = vcmp.eq.f32.partialorder %v1282_v62, 8.507059e+37 }
 0x43b   :  { %v2027_v57 = vpop.eup %2026 }
 0x43c   :  { %v1274_v58 = vmul.f32 %v2027_v57, %v1272_v56  ;;  %vm1279_vm7 = vweird.f32 %v2027_v57 }
 0x43d   :  { %vm1280_vm9 = vmor %vm1278_vm8, %vm1279_vm7 }
 0x43e   :  { %v1275_v59 = vsub.f32 1.0, %v1274_v58 }
 0x440   :  { %v1276_v61 = vmul.f32 %v2027_v57, %v1275_v59 }
 0x442   :  { %v1277_v63 = vadd.f32 %v2027_v57, %v1276_v61 }
 0x444   :  { %v1281_v2 = vsel %vm1280_vm9, %v2027_v57, %v1277_v63 }
 0x445   :  { %v1286_v3 = vsel %vm1283_vm10, %v1285_v32, %v1281_v2 }
 0x446   :  { %v1288_v6 = vadd.f32 0.5, %v1286_v3 }
 0x448   :  { %1293 = vrot.lane.b32.xlu0 %v1288_v6, %s2060_s13 }
 0x4a5   :  { %v1244_v8 = vpop.f32.mrf.mxu0 }
 0x4a6   :  { %v1245_v45 = vadd.f32 %v1244_v8, %v1137_v9 }
 0x4ab   :  { %v1257_v4 = vpop.f32.mrf.mxu1 }
 0x4ac   :  { %v1258_v10 = vadd.f32 %v1257_v4, %v1245_v45 }
 0x4ad   :  { %v1246_v11 = vpop.f32.mrf.mxu0 }
 0x4ae   :  { %2028 = vtanh.f32 %v1258_v10  ;;  %1263 = vrot.lane.b32.xlu1 %v1258_v10, %s2061_s16 }
 0x4b3   :  { %v1259_v12 = vpop.f32.mrf.mxu1 }
 0x4b4   :  { %v2199_v46 = vpop.eup %2028 }
 0x4b5   :  { %vm1299_vm12 = vcmp.ne.f32.partialorder %v2199_v46, %v2199_v46 }
 0x4b6   :  { %v1300_v14 = vsel %vm1299_vm12, 1.0, %v2059_v5 }
 0x4b7   :  { %v1302_v1 = vsel %vm1301_vm11, %v1300_v14, -inf }
 0x4b8   :  { %1303 = vmax.xlane.f32.xlu2 %v1302_v1 }
 0x4ba   :  { %v1294_v17 = vpop.permute.xlu0 %1293 }
 0x4bb   :  { %v1296_v18 = vmul.f32 %v1294_v17, %v1290_v16 }
 0x4bd   :  { %v1297_v19 = vmax.f32 %v1296_v18, 0.01 }
 0x4bf   :  { %v1298_v20 = vmin.f32 %v1297_v19, 1.0 }
 0x4c1   :  { %vm1317_vm13 = vcmp.ne.f32.partialorder %v1298_v20, %v1298_v20 }
 0x4c2   :  { %v1318_v21 = vsel %vm1317_vm13, 1.0, %v2059_v5 }
 0x4c3   :  { %v1319_v22 = vsel %vm1301_vm11, %v1318_v21, -inf }
 0x4c4   :  { %1320 = vmax.xlane.f32.xlu2 %v1319_v22 }
 0x520   :  { %v1264_v23 = vpop.permute.xlu1 %1263 }
 0x521   :  { %v1266_v24 = vmin.f32 %v1258_v10, %v1264_v23 }
 0x523   :  { %vm1334_vm15 = vcmp.ne.f32.partialorder %v1266_v24, %v1266_v24 }
 0x524   :  { %v1335_v0 = vsel %vm1334_vm15, 1.0, %v2059_v5 }
 0x525   :  { %v1337_v25 = vsel %vm1336_vm14, %v1335_v0, -inf }
 0x526   :  { %1338 = vmax.xlane.f32.xlu2 %v1337_v25 }
 0x52b   :  { %v1304_v26 = vpop.xlane.xlu2 %1303 }
 0x52c   :  { %v1305_v27 = vrot.slane %v1304_v26, 4 }
 0x52e   :  { %v1306_v28 = vmax.f32 %v1304_v26, %v1305_v27 }
 0x530   :  { %v1307_v29 = vrot.slane %v1306_v28, 2 }
 0x532   :  { %v1308_v30 = vmax.f32 %v1306_v28, %v1307_v29 }
 0x534   :  { %v1309_v15 = vrot.slane %v1308_v30, 1 }
 0x536   :  { %v1310_v31 = vmax.f32 %v1308_v30, %v1309_v15 }
 0x537   :  { %v1321_v35 = vpop.xlane.xlu2 %1320 }
 0x538   :  { %v1322_v36 = vrot.slane %v1321_v35, 4  ;;  %2008 = vpush %v1310_v31 }
 0x53a   :  { %v1323_v37 = vmax.f32 %v1321_v35, %v1322_v36 }
 0x53c   :  { %v1324_v38 = vrot.slane %v1323_v37, 2 }
 0x53e   :  { %v1325_v39 = vmax.f32 %v1323_v37, %v1324_v38 }
 0x540   :  { %v1326_v40 = vrot.slane %v1325_v39, 1 }
 0x542   :  { %v1327_v33 = vmax.f32 %v1325_v39, %v1326_v40 }
 0x544   :  { %2010 = vpush %v1327_v33 }
 0x569   :  { %s2009_s3 = spop %2008 }
 0x56a   :  { %p1312_p4 = scmp.gt.f32.partialorder %s2009_s3, 0.0 }
 0x56c   :  { %s1313_s24 = scalar_select %p1312_p4, 1, 0 }
 0x56e   :  { %v1314_v52 = vstv %s1313_s24 }
 0x56f   :  { %vm1315_vm2 = vcmp.eq.s32.totalorder %v1314_v52, 1 }
 0x570   :  { %v1316_v54 = vsel %vm1315_vm2, 0.0, %v2199_v46 }
 0x575   :  { %s2011_s19 = spop %2010 }
 0x576   :  { %p1329_p2 = scmp.gt.f32.partialorder %s2011_s19, 0.0 }
 0x578   :  { %s1330_s20 = scalar_select %p1329_p2, 1, 0 }
 0x57a   :  { %v1331_v5 = vstv %s1330_s20 }
 0x57b   :  { %vm1332_vm0 = vcmp.eq.s32.totalorder %v1331_v5, 1 }
 0x57c   :  { %v1333_v41 = vsel %vm1332_vm0, 0.1, %v1298_v20 }
 0x57d   :  { %1353 = vrot.lane.b32.xlu0 %v1333_v41, %s2058_s21 }
 0x599   :  { %v1339_v42 = vpop.xlane.xlu2 %1338 }
 0x59a   :  { %v1340_v43 = vrot.slane %v1339_v42, 4 }
 0x59c   :  { %v1341_v44 = vmax.f32 %v1339_v42, %v1340_v43 }
 0x59e   :  { %v1342_v47 = vrot.slane %v1341_v44, 2 }
 0x5a0   :  { %v1343_v34 = vmax.f32 %v1341_v44, %v1342_v47 }
 0x5a2   :  { %v1344_v48 = vrot.slane %v1343_v34, 1 }
 0x5a4   :  { %v1345_v49 = vmax.f32 %v1343_v34, %v1344_v48 }
 0x5a6   :  { %2012 = vpush %v1345_v49 }
 0x5d7   :  { %s2013_s22 = spop %2012 }
 0x5d8   :  { %p1347_p3 = scmp.gt.f32.partialorder %s2013_s22, 0.0 }
 0x5da   :  { %s1348_s23 = scalar_select %p1347_p3, 1, 0 }
 0x5dc   :  { %v1349_v50 = vstv %s1348_s23 }
 0x5dd   :  { %vm1350_vm1 = vcmp.eq.s32.totalorder %v1349_v50, 1 }
 0x5de   :  { %v1351_v51 = vsel %vm1350_vm1, 0.0, %v1266_v24 }
 0x5df   :  { %1357 = vrot.lane.b32.xlu2 %v1351_v51, %s2058_s21 }
 0x5ef   :  { %v1354_v53 = vpop.permute.xlu0 %1353 }
 0x5f0   :  { %v1360_v55 = vsel %vm1301_vm11, %v1316_v54, %v1354_v53 }
 0x639   :  { %v1358_v56 = vpop.permute.xlu2 %1357 }
 0x63a   :  { %v1362_v57 = vsel %vm1361_vm3, %v1360_v55, %v1358_v56 }
 0x63b   :  { %v1364_v58 = vsel %vm1363_vm4, %v1362_v57, 0.0 }
 0x63c   :  { %1365 = vst [vmem:[%s2222_s4] sm:$0xff] %v1364_v58 }
 0x63d   :  { %1370 = vsyncpa [#allocation3], 1 }

</bundles_post_ra>
